<compile_context>
chip_gen: v7x
topology: tpu7x:2x2x1
jax: 0.10.0
libtpu: 0.0.40
codegen_flags: <defaults>
</compile_context>

<pallas_src>
import functools
import math

import jax
import jax.numpy as jnp
from jax.experimental import pallas as pl
from jax.experimental.pallas import tpu as pltpu

_BN_EPS = 1e-5


# ----------------------------- Pallas kernel ------------------------------- #

def _whole_model_kernel(x_ref,
                        w1c_ref, s1c_ref, wstc_ref, sstc_ref, w2c_ref, b2c_ref,
                        w1h_ref, s1h_ref, wsth_ref, ssth_ref, w2h_ref, b2h_ref,
                        out_ref, *, num_stage_comb, num_head_stages):
    """Fused forward of LinearModelComplete (eval mode) for one batch tile."""

    def dense(inp, w, shift, relu):
        # bf16 operands, f32 accumulation; shift is f32 [1, N] (BN folded in).
        y = jnp.dot(inp.astype(w.dtype), w,
                    preferred_element_type=jnp.float32) + shift
        return jnp.maximum(y, 0.0) if relu else y

    # ---- combined LinearModel: w1 -> (bn folded) -> relu -> stages -> w2 ----
    y = dense(x_ref[...], w1c_ref[...], s1c_ref[...], True)
    for st in range(num_stage_comb):
        h = dense(y, wstc_ref[2 * st], sstc_ref[2 * st], True)
        h = dense(h, wstc_ref[2 * st + 1], sstc_ref[2 * st + 1], True)
        y = y + h                                    # residual (Linear block)
    y = dense(y, w2c_ref[...], b2c_ref[...], False)  # plain linear, no bn/relu

    # ---- all heads' first layer: one lane-concatenated matmul ----
    h_all = dense(y, w1h_ref[...], s1h_ref[...], True)      # [TB, H*L]

    # ---- fused block-diagonal head residual stages ----
    # Heads with fewer stages have zero weight/shift blocks -> t-block is 0 and
    # the residual add is a true identity skip (no ReLU clipping issue).
    for st in range(num_head_stages):
        t = dense(h_all, wsth_ref[2 * st], ssth_ref[2 * st], True)
        t = dense(t, wsth_ref[2 * st + 1], ssth_ref[2 * st + 1], True)
        h_all = h_all + t

    # ---- all heads' final projections: one lane-dense [H*L, out_pad] matmul ----
    out_ref[...] = dense(h_all, w2h_ref[...], b2h_ref[...], False)


def build_forward(static):
    """Returns a jitted forward(x, arrays) -> results dict, one pallas_call total."""
    num_stage_comb = static["num_stage_comb"]
    num_head_stages = static["num_head_stages"]
    out_pad = static["out_pad"]
    output_info = static["output_info"]

    kernel = functools.partial(
        _whole_model_kernel,
        num_stage_comb=num_stage_comb,
        num_head_stages=num_head_stages,
    )

    def forward(x, arrays):
        B, in_dim = x.shape

        # Batch tile: whole batch when small; 256/128-row tiles for large B so
        # activation DMA pipelines against compute and v7x megacore can shard.
        if B <= 256:
            tb = B
        elif B % 256 == 0:
            tb = 256
        elif B % 128 == 0:
            tb = 128
        else:
            tb = B
        grid = (B // tb,)

        def const_spec(a):
            return pl.BlockSpec(a.shape, lambda i, nd=a.ndim: (0,) * nd)

        in_specs = [pl.BlockSpec((tb, in_dim), lambda i: (i, 0))]
        in_specs += [const_spec(a) for a in arrays]
        out_spec = pl.BlockSpec((tb, out_pad), lambda i: (i, 0))

        weight_bytes = sum(int(a.size) * a.dtype.itemsize for a in arrays)
        vmem_limit = int(min(128 * (1 << 20),
                             max(32 * (1 << 20), 2 * weight_bytes + (16 << 20))))

        slab = pl.pallas_call(
            kernel,
            out_shape=jax.ShapeDtypeStruct((B, out_pad), jnp.float32),
            grid=grid,
            in_specs=in_specs,
            out_specs=out_spec,
            compiler_params=pltpu.CompilerParams(
                dimension_semantics=("parallel",),
                vmem_limit_bytes=vmem_limit),
        )(x, *arrays)

        results = {}
        for el in output_info:
            o, n = el["offset"], el["n"]
            out = slab[:, o:o + n]
            if el["name"] == "pose":
                out = out.reshape((-1, el["out_shape"][0], el["out_shape"][1]))
            results[el["name"]] = out
        results["normflow_z"] = None          # structure_pose_net == 'default'
        return results

    return jax.jit(forward)


# --------------------------- parameter construction ------------------------ #

def _init_linear(key, fan_in, fan_out):
    # PyTorch nn.Linear default init: U(-1/sqrt(fan_in), 1/sqrt(fan_in)).
    # Weight stored as [in, out] so the kernel computes y = x @ W.
    kw, kb = jax.random.split(key)
    bound = 1.0 / math.sqrt(fan_in)
    W = jax.random.uniform(kw, (fan_in, fan_out), jnp.float32, -bound, bound)
    b = jax.random.uniform(kb, (fan_out,), jnp.float32, -bound, bound)
    return W, b


def _init_bn(key, n):
    # Non-trivial running statistics / affine params so the eval-mode BN fold is
    # actually exercised (PyTorch defaults are a special case of the same math).
    k1, k2, k3, k4 = jax.random.split(key, 4)
    gamma = jax.random.uniform(k1, (n,), jnp.float32, 0.5, 1.5)
    beta = 0.1 * jax.random.normal(k2, (n,), jnp.float32)
    running_mean = 0.1 * jax.random.normal(k3, (n,), jnp.float32)
    running_var = jax.random.uniform(k4, (n,), jnp.float32, 0.5, 1.5)
    return gamma, beta, running_mean, running_var


def init_linear_model(key, input_size, linear_size, num_stage, output_size):
    n_lin = 2 + 2 * num_stage
    n_bn = 1 + 2 * num_stage
    keys = jax.random.split(key, n_lin + n_bn)
    lin_keys, bn_keys = keys[:n_lin], keys[n_lin:]
    params = {
        "w1": _init_linear(lin_keys[0], input_size, linear_size),
        "bn1": _init_bn(bn_keys[0], linear_size),
        "stages": [],
        "w2": _init_linear(lin_keys[1], linear_size, output_size),
    }
    for s in range(num_stage):
        lin_a = _init_linear(lin_keys[2 + 2 * s], linear_size, linear_size)
        bn_a = _init_bn(bn_keys[1 + 2 * s], linear_size)
        lin_b = _init_linear(lin_keys[3 + 2 * s], linear_size, linear_size)
        bn_b = _init_bn(bn_keys[2 + 2 * s], linear_size)
        params["stages"].append((lin_a, bn_a, lin_b, bn_b))
    return params


def init_complete_model(key, *, linear_size, num_stage_comb, num_stage_heads,
                        num_stage_heads_pose, input_size, intermediate_size, n_joints):
    # Default configuration: structure_pose_net='default', trans_sep=False,
    # no z / segbps appended to the input.
    output_info = [
        {"name": "pose", "n": n_joints * 6, "out_shape": [n_joints, 6],
         "num_stage": num_stage_heads_pose},
        {"name": "trans", "n": 3, "num_stage": num_stage_heads},
        {"name": "flength", "n": 1, "num_stage": num_stage_heads},
    ]
    k_comb, *k_heads = jax.random.split(key, 1 + len(output_info))
    params = {
        "combined": init_linear_model(k_comb, input_size, linear_size,
                                      num_stage_comb, intermediate_size),
        "heads": [],
        "output_info": output_info,
    }
    for el, kh in zip(output_info, k_heads):
        params["heads"].append(
            init_linear_model(kh, intermediate_size, linear_size, el["num_stage"], el["n"]))
    return params


# ----------------------- parameter folding / fusion ------------------------ #

def _fold_bn(bias, bn):
    """Linear-bias + eval-mode BatchNorm -> (per-feature scale, shift)."""
    gamma, beta, mean, var = bn
    s = gamma * jax.lax.rsqrt(var + _BN_EPS)
    shift = bias * s + (beta - mean * s)
    return s, shift


def _fuse_linear_model(p):
    """Fold BN scale into weights, stack stage layers for one LinearModel (f32)."""
    W1, b1 = p["w1"]
    s1, t1 = _fold_bn(b1, p["bn1"])
    W1f = W1 * s1[None, :]

    wst, sst = [], []
    for (lin_a, bn_a, lin_b, bn_b) in p["stages"]:
        Wa, ba = lin_a
        sa, ta = _fold_bn(ba, bn_a)
        wst.append(Wa * sa[None, :]); sst.append(ta)
        Wb, bb = lin_b
        sb, tb = _fold_bn(bb, bn_b)
        wst.append(Wb * sb[None, :]); sst.append(tb)

    if wst:
        wst = jnp.stack(wst)                      # [2*ns, L, L]
        sst = jnp.stack(sst)[:, None, :]          # [2*ns, 1, L]
    else:                                         # dummy, never indexed
        wst = jnp.zeros((1, 8, 128), jnp.float32)
        sst = jnp.zeros((1, 1, 128), jnp.float32)

    W2, b2 = p["w2"]
    return dict(w1=W1f, s1=t1[None, :], wst=wst, sst=sst,
                w2=W2, b2=b2[None, :], num_stage=len(p["stages"]))


def fuse_complete_model(params, compute_dtype=jnp.bfloat16):
    """Build the flat argument tuple + static structure for the fused kernel."""
    comb = _fuse_linear_model(params["combined"])
    heads = [_fuse_linear_model(h) for h in params["heads"]]
    L = comb["w2"].shape[0]                       # linear_size
    H = len(heads)
    HL = H * L

    # heads' first layers share the same input -> lane-concatenate weights.
    w1h = jnp.concatenate([h["w1"] for h in heads], axis=1)   # [inter, H*L]
    s1h = jnp.concatenate([h["s1"] for h in heads], axis=1)   # [1, H*L]

    # Block-diagonal fused head residual stages.  Heads with fewer stages keep
    # zero weight/shift blocks: the residual add then acts as a true skip.
    num_head_stages = max([h["num_stage"] for h in heads] + [0])
    if num_head_stages > 0:
        wsth = jnp.zeros((2 * num_head_stages, HL, HL), jnp.float32)
        ssth = jnp.zeros((2 * num_head_stages, 1, HL), jnp.float32)
        for i, h in enumerate(heads):
            for layer in range(2 * h["num_stage"]):
                wsth = wsth.at[layer, i * L:(i + 1) * L, i * L:(i + 1) * L].set(
                    h["wst"][layer])
                ssth = ssth.at[layer, :, i * L:(i + 1) * L].set(h["sst"][layer])
    else:                                         # dummy, never indexed
        wsth = jnp.zeros((1, 8, 128), jnp.float32)
        ssth = jnp.zeros((1, 1, 128), jnp.float32)

    # pack the tiny head outputs into one lane-dense slab; flatten the heads'
    # final projections into a single [H*L, out_pad] matrix (disjoint columns).
    off = 0
    output_info = []
    for el in params["output_info"]:
        entry = dict(el)
        entry["offset"] = off
        off += el["n"]
        output_info.append(entry)
    total = off
    out_pad = max(128, ((total + 127) // 128) * 128)

    w2h_flat = jnp.zeros((HL, out_pad), jnp.float32)
    b2h = jnp.zeros((1, out_pad), jnp.float32)
    for i, (h, el) in enumerate(zip(heads, output_info)):
        o, n = el["offset"], el["n"]
        w2h_flat = w2h_flat.at[i * L:(i + 1) * L, o:o + n].set(h["w2"])
        b2h = b2h.at[:, o:o + n].set(h["b2"])

    cd = compute_dtype
    arrays = [
        comb["w1"].astype(cd), comb["s1"],
        comb["wst"].astype(cd), comb["sst"],
        comb["w2"].astype(cd), comb["b2"],
        w1h.astype(cd), s1h,
        wsth.astype(cd), ssth,
        w2h_flat.astype(cd), b2h,
    ]

    static = dict(
        num_stage_comb=comb["num_stage"],
        num_head_stages=num_head_stages,
        linear_size=L,
        out_pad=out_pad,
        output_info=output_info,
    )
    return tuple(arrays), static


# ------------------------- pure-JAX reference (check) ---------------------- #

_HP = jax.lax.Precision.HIGHEST


def _ref_linear_model(p, x):
    def bn(y, bnp):
        g, b, m, v = bnp
        return (y - m) * (g * jax.lax.rsqrt(v + _BN_EPS)) + b

    W1, b1 = p["w1"]
    y = jnp.maximum(bn(jnp.dot(x, W1, precision=_HP) + b1, p["bn1"]), 0.0)
    for (lin_a, bn_a, lin_b, bn_b) in p["stages"]:
        Wa, ba = lin_a
        Wb, bb = lin_b
        h = jnp.maximum(bn(jnp.dot(y, Wa, precision=_HP) + ba, bn_a), 0.0)
        h = jnp.maximum(bn(jnp.dot(h, Wb, precision=_HP) + bb, bn_b), 0.0)
        y = y + h
    W2, b2 = p["w2"]
    return jnp.dot(y, W2, precision=_HP) + b2


def reference_forward(params, x):
    y = _ref_linear_model(params["combined"], x)
    res = {}
    for el, head in zip(params["output_info"], params["heads"]):
        out = _ref_linear_model(head, y)
        if el["name"] == "pose":
            out = out.reshape((-1, el["out_shape"][0], el["out_shape"][1]))
        res[el["name"]] = out
    res["normflow_z"] = None
    return res


# --------------------------------- main ------------------------------------ #

if __name__ == "__main__":
    # Small configuration consistent with the module's constructor.
    BATCH = 8
    INPUT_SIZE = 16 * 2        # default input_size
    LINEAR_SIZE = 128          # scaled-down linear_size
    INTERMEDIATE_SIZE = 128    # scaled-down intermediate_size
    N_JOINTS = 4               # scaled-down n_joints -> pose head outputs 4*6=24
    NUM_STAGE_COMB = 2
    NUM_STAGE_HEADS = 1
    NUM_STAGE_HEADS_POSE = 1

    root_key = jax.random.PRNGKey(0)
    k_params, k_input = jax.random.split(root_key)

    params = init_complete_model(
        k_params,
        linear_size=LINEAR_SIZE,
        num_stage_comb=NUM_STAGE_COMB,
        num_stage_heads=NUM_STAGE_HEADS,
        num_stage_heads_pose=NUM_STAGE_HEADS_POSE,
        input_size=INPUT_SIZE,
        intermediate_size=INTERMEDIATE_SIZE,
        n_joints=N_JOINTS,
    )
    x = jax.random.normal(k_input, (BATCH, INPUT_SIZE), jnp.float32)

    # One-time parameter folding / packing; single fused pallas_call per forward.
    arrays, static = fuse_complete_model(params)
    forward = build_forward(static)

    results = forward(x, arrays)
    jax.tree_util.tree_map(jax.block_until_ready, results)

    assert results["pose"].shape == (BATCH, N_JOINTS, 6)
    assert results["trans"].shape == (BATCH, 3)
    assert results["flength"].shape == (BATCH, 1)
    assert results["normflow_z"] is None

    # Numerical check against a pure-JAX eval-mode reference of the original
    # module (reference in f32 HIGHEST precision; kernel uses bf16 weights with
    # f32 accumulation, hence the 5e-2 tolerance).
    ref = reference_forward(params, x)
    for name in ("pose", "trans", "flength"):
        got = jnp.asarray(results[name])
        want = jnp.asarray(ref[name])
        assert got.shape == want.shape, (name, got.shape, want.shape)
        assert jnp.allclose(got, want, rtol=5e-2, atol=5e-2), f"mismatch in {name}"

    print("KERNEL_OK")
</pallas_src>

<mosaic_0001>
module attributes {stable_mosaic.version = 11 : i64} {
  func.func @_whole_model_kernel(%arg0: i32, %arg1: memref<8x32xf32, #tpu.memory_space<vmem>>, %arg2: memref<32x128xbf16, #tpu.memory_space<vmem>>, %arg3: memref<1x128xf32, #tpu.memory_space<vmem>>, %arg4: memref<4x128x128xbf16, #tpu.memory_space<vmem>>, %arg5: memref<4x1x128xf32, #tpu.memory_space<vmem>>, %arg6: memref<128x128xbf16, #tpu.memory_space<vmem>>, %arg7: memref<1x128xf32, #tpu.memory_space<vmem>>, %arg8: memref<128x384xbf16, #tpu.memory_space<vmem>>, %arg9: memref<1x384xf32, #tpu.memory_space<vmem>>, %arg10: memref<2x384x384xbf16, #tpu.memory_space<vmem>>, %arg11: memref<2x1x384xf32, #tpu.memory_space<vmem>>, %arg12: memref<384x128xbf16, #tpu.memory_space<vmem>>, %arg13: memref<1x128xf32, #tpu.memory_space<vmem>>, %arg14: memref<8x128xf32, #tpu.memory_space<vmem>>) attributes {dimension_semantics = [#tpu.dimension_semantics<parallel>], iteration_bounds = array<i64: 1>, scalar_prefetch = 0 : i64, scratch_operands = 0 : i64, tpu.core_type = #tpu.core_type<tc>, window_params = [{transform_indices = @transform_0, window_bounds = array<i64: 8, 32>}, {pipeline_mode = #tpu.pipeline_mode<synchronous>, transform_indices = @transform_1, window_bounds = array<i64: 32, 128>}, {pipeline_mode = #tpu.pipeline_mode<synchronous>, transform_indices = @transform_2, window_bounds = array<i64: 1, 128>}, {pipeline_mode = #tpu.pipeline_mode<synchronous>, transform_indices = @transform_3, window_bounds = array<i64: 4, 128, 128>}, {pipeline_mode = #tpu.pipeline_mode<synchronous>, transform_indices = @transform_4, window_bounds = array<i64: 4, 1, 128>}, {pipeline_mode = #tpu.pipeline_mode<synchronous>, transform_indices = @transform_5, window_bounds = array<i64: 128, 128>}, {pipeline_mode = #tpu.pipeline_mode<synchronous>, transform_indices = @transform_6, window_bounds = array<i64: 1, 128>}, {pipeline_mode = #tpu.pipeline_mode<synchronous>, transform_indices = @transform_7, window_bounds = array<i64: 128, 384>}, {pipeline_mode = #tpu.pipeline_mode<synchronous>, transform_indices = @transform_8, window_bounds = array<i64: 1, 384>}, {pipeline_mode = #tpu.pipeline_mode<synchronous>, transform_indices = @transform_9, window_bounds = array<i64: 2, 384, 384>}, {pipeline_mode = #tpu.pipeline_mode<synchronous>, transform_indices = @transform_10, window_bounds = array<i64: 2, 1, 384>}, {pipeline_mode = #tpu.pipeline_mode<synchronous>, transform_indices = @transform_11, window_bounds = array<i64: 384, 128>}, {pipeline_mode = #tpu.pipeline_mode<synchronous>, transform_indices = @transform_12, window_bounds = array<i64: 1, 128>}, {transform_indices = @transform_13, window_bounds = array<i64: 8, 128>}]} {
    %c0 = arith.constant 0 : index
    %c0_0 = arith.constant 0 : index
    %0 = vector.load %arg1[%c0, %c0_0] : memref<8x32xf32, #tpu.memory_space<vmem>>, vector<8x32xf32>
    %c0_1 = arith.constant 0 : index
    %c0_2 = arith.constant 0 : index
    %1 = vector.load %arg2[%c0_1, %c0_2] : memref<32x128xbf16, #tpu.memory_space<vmem>>, vector<32x128xbf16>
    %c0_3 = arith.constant 0 : index
    %c0_4 = arith.constant 0 : index
    %2 = vector.load %arg3[%c0_3, %c0_4] : memref<1x128xf32, #tpu.memory_space<vmem>>, vector<1x128xf32>
    %3 = arith.truncf %0 : vector<8x32xf32> to vector<8x32xbf16>
    %cst = arith.constant dense<0.000000e+00> : vector<8x128xf32>
    %4 = tpu.matmul %3, %1, %cst {dimension_numbers = #tpu.dot_dimension_numbers<[1], [0], [0], [1], [0, 0, 1, 1], [], []>} : vector<8x32xbf16>, vector<32x128xbf16>, vector<8x128xf32> -> vector<8x128xf32>
    %5 = vector.broadcast %2 : vector<1x128xf32> to vector<8x128xf32>
    %6 = arith.addf %4, %5 : vector<8x128xf32>
    %cst_5 = arith.constant 0.000000e+00 : f32
    %7 = vector.broadcast %cst_5 : f32 to vector<8x128xf32>
    %8 = arith.maximumf %6, %7 : vector<8x128xf32>
    %c0_6 = arith.constant 0 : index
    %c0_7 = arith.constant 0 : index
    %c0_8 = arith.constant 0 : index
    %9 = vector.load %arg4[%c0_6, %c0_7, %c0_8] : memref<4x128x128xbf16, #tpu.memory_space<vmem>>, vector<1x128x128xbf16>
    %10 = vector.shape_cast %9 : vector<1x128x128xbf16> to vector<128x128xbf16>
    %c0_9 = arith.constant 0 : index
    %c0_10 = arith.constant 0 : index
    %c0_11 = arith.constant 0 : index
    %11 = vector.load %arg5[%c0_9, %c0_10, %c0_11] : memref<4x1x128xf32, #tpu.memory_space<vmem>>, vector<1x1x128xf32>
    %12 = vector.shape_cast %11 : vector<1x1x128xf32> to vector<1x128xf32>
    %13 = arith.truncf %8 : vector<8x128xf32> to vector<8x128xbf16>
    %cst_12 = arith.constant dense<0.000000e+00> : vector<8x128xf32>
    %14 = tpu.matmul %13, %10, %cst_12 {dimension_numbers = #tpu.dot_dimension_numbers<[1], [0], [0], [1], [0, 0, 1, 1], [], []>} : vector<8x128xbf16>, vector<128x128xbf16>, vector<8x128xf32> -> vector<8x128xf32>
    %15 = vector.broadcast %12 : vector<1x128xf32> to vector<8x128xf32>
    %16 = arith.addf %14, %15 : vector<8x128xf32>
    %cst_13 = arith.constant 0.000000e+00 : f32
    %17 = vector.broadcast %cst_13 : f32 to vector<8x128xf32>
    %18 = arith.maximumf %16, %17 : vector<8x128xf32>
    %c1 = arith.constant 1 : index
    %c0_14 = arith.constant 0 : index
    %c0_15 = arith.constant 0 : index
    %19 = vector.load %arg4[%c1, %c0_14, %c0_15] : memref<4x128x128xbf16, #tpu.memory_space<vmem>>, vector<1x128x128xbf16>
    %20 = vector.shape_cast %19 : vector<1x128x128xbf16> to vector<128x128xbf16>
    %c1_16 = arith.constant 1 : index
    %c0_17 = arith.constant 0 : index
    %c0_18 = arith.constant 0 : index
    %21 = vector.load %arg5[%c1_16, %c0_17, %c0_18] : memref<4x1x128xf32, #tpu.memory_space<vmem>>, vector<1x1x128xf32>
    %22 = vector.shape_cast %21 : vector<1x1x128xf32> to vector<1x128xf32>
    %23 = arith.truncf %18 : vector<8x128xf32> to vector<8x128xbf16>
    %cst_19 = arith.constant dense<0.000000e+00> : vector<8x128xf32>
    %24 = tpu.matmul %23, %20, %cst_19 {dimension_numbers = #tpu.dot_dimension_numbers<[1], [0], [0], [1], [0, 0, 1, 1], [], []>} : vector<8x128xbf16>, vector<128x128xbf16>, vector<8x128xf32> -> vector<8x128xf32>
    %25 = vector.broadcast %22 : vector<1x128xf32> to vector<8x128xf32>
    %26 = arith.addf %24, %25 : vector<8x128xf32>
    %cst_20 = arith.constant 0.000000e+00 : f32
    %27 = vector.broadcast %cst_20 : f32 to vector<8x128xf32>
    %28 = arith.maximumf %26, %27 : vector<8x128xf32>
    %29 = arith.addf %8, %28 : vector<8x128xf32>
    %c2 = arith.constant 2 : index
    %c0_21 = arith.constant 0 : index
    %c0_22 = arith.constant 0 : index
    %30 = vector.load %arg4[%c2, %c0_21, %c0_22] : memref<4x128x128xbf16, #tpu.memory_space<vmem>>, vector<1x128x128xbf16>
    %31 = vector.shape_cast %30 : vector<1x128x128xbf16> to vector<128x128xbf16>
    %c2_23 = arith.constant 2 : index
    %c0_24 = arith.constant 0 : index
    %c0_25 = arith.constant 0 : index
    %32 = vector.load %arg5[%c2_23, %c0_24, %c0_25] : memref<4x1x128xf32, #tpu.memory_space<vmem>>, vector<1x1x128xf32>
    %33 = vector.shape_cast %32 : vector<1x1x128xf32> to vector<1x128xf32>
    %34 = arith.truncf %29 : vector<8x128xf32> to vector<8x128xbf16>
    %cst_26 = arith.constant dense<0.000000e+00> : vector<8x128xf32>
    %35 = tpu.matmul %34, %31, %cst_26 {dimension_numbers = #tpu.dot_dimension_numbers<[1], [0], [0], [1], [0, 0, 1, 1], [], []>} : vector<8x128xbf16>, vector<128x128xbf16>, vector<8x128xf32> -> vector<8x128xf32>
    %36 = vector.broadcast %33 : vector<1x128xf32> to vector<8x128xf32>
    %37 = arith.addf %35, %36 : vector<8x128xf32>
    %cst_27 = arith.constant 0.000000e+00 : f32
    %38 = vector.broadcast %cst_27 : f32 to vector<8x128xf32>
    %39 = arith.maximumf %37, %38 : vector<8x128xf32>
    %c3 = arith.constant 3 : index
    %c0_28 = arith.constant 0 : index
    %c0_29 = arith.constant 0 : index
    %40 = vector.load %arg4[%c3, %c0_28, %c0_29] : memref<4x128x128xbf16, #tpu.memory_space<vmem>>, vector<1x128x128xbf16>
    %41 = vector.shape_cast %40 : vector<1x128x128xbf16> to vector<128x128xbf16>
    %c3_30 = arith.constant 3 : index
    %c0_31 = arith.constant 0 : index
    %c0_32 = arith.constant 0 : index
    %42 = vector.load %arg5[%c3_30, %c0_31, %c0_32] : memref<4x1x128xf32, #tpu.memory_space<vmem>>, vector<1x1x128xf32>
    %43 = vector.shape_cast %42 : vector<1x1x128xf32> to vector<1x128xf32>
    %44 = arith.truncf %39 : vector<8x128xf32> to vector<8x128xbf16>
    %cst_33 = arith.constant dense<0.000000e+00> : vector<8x128xf32>
    %45 = tpu.matmul %44, %41, %cst_33 {dimension_numbers = #tpu.dot_dimension_numbers<[1], [0], [0], [1], [0, 0, 1, 1], [], []>} : vector<8x128xbf16>, vector<128x128xbf16>, vector<8x128xf32> -> vector<8x128xf32>
    %46 = vector.broadcast %43 : vector<1x128xf32> to vector<8x128xf32>
    %47 = arith.addf %45, %46 : vector<8x128xf32>
    %cst_34 = arith.constant 0.000000e+00 : f32
    %48 = vector.broadcast %cst_34 : f32 to vector<8x128xf32>
    %49 = arith.maximumf %47, %48 : vector<8x128xf32>
    %50 = arith.addf %29, %49 : vector<8x128xf32>
    %c0_35 = arith.constant 0 : index
    %c0_36 = arith.constant 0 : index
    %51 = vector.load %arg6[%c0_35, %c0_36] : memref<128x128xbf16, #tpu.memory_space<vmem>>, vector<128x128xbf16>
    %c0_37 = arith.constant 0 : index
    %c0_38 = arith.constant 0 : index
    %52 = vector.load %arg7[%c0_37, %c0_38] : memref<1x128xf32, #tpu.memory_space<vmem>>, vector<1x128xf32>
    %53 = arith.truncf %50 : vector<8x128xf32> to vector<8x128xbf16>
    %cst_39 = arith.constant dense<0.000000e+00> : vector<8x128xf32>
    %54 = tpu.matmul %53, %51, %cst_39 {dimension_numbers = #tpu.dot_dimension_numbers<[1], [0], [0], [1], [0, 0, 1, 1], [], []>} : vector<8x128xbf16>, vector<128x128xbf16>, vector<8x128xf32> -> vector<8x128xf32>
    %55 = vector.broadcast %52 : vector<1x128xf32> to vector<8x128xf32>
    %56 = arith.addf %54, %55 : vector<8x128xf32>
    %c0_40 = arith.constant 0 : index
    %c0_41 = arith.constant 0 : index
    %57 = vector.load %arg8[%c0_40, %c0_41] : memref<128x384xbf16, #tpu.memory_space<vmem>>, vector<128x384xbf16>
    %c0_42 = arith.constant 0 : index
    %c0_43 = arith.constant 0 : index
    %58 = vector.load %arg9[%c0_42, %c0_43] : memref<1x384xf32, #tpu.memory_space<vmem>>, vector<1x384xf32>
    %59 = arith.truncf %56 : vector<8x128xf32> to vector<8x128xbf16>
    %cst_44 = arith.constant dense<0.000000e+00> : vector<8x384xf32>
    %60 = tpu.matmul %59, %57, %cst_44 {dimension_numbers = #tpu.dot_dimension_numbers<[1], [0], [0], [1], [0, 0, 1, 1], [], []>} : vector<8x128xbf16>, vector<128x384xbf16>, vector<8x384xf32> -> vector<8x384xf32>
    %61 = vector.broadcast %58 : vector<1x384xf32> to vector<8x384xf32>
    %62 = arith.addf %60, %61 : vector<8x384xf32>
    %cst_45 = arith.constant 0.000000e+00 : f32
    %63 = vector.broadcast %cst_45 : f32 to vector<8x384xf32>
    %64 = arith.maximumf %62, %63 : vector<8x384xf32>
    %c0_46 = arith.constant 0 : index
    %c0_47 = arith.constant 0 : index
    %c0_48 = arith.constant 0 : index
    %65 = vector.load %arg10[%c0_46, %c0_47, %c0_48] : memref<2x384x384xbf16, #tpu.memory_space<vmem>>, vector<1x384x384xbf16>
    %66 = vector.shape_cast %65 : vector<1x384x384xbf16> to vector<384x384xbf16>
    %c0_49 = arith.constant 0 : index
    %c0_50 = arith.constant 0 : index
    %c0_51 = arith.constant 0 : index
    %67 = vector.load %arg11[%c0_49, %c0_50, %c0_51] : memref<2x1x384xf32, #tpu.memory_space<vmem>>, vector<1x1x384xf32>
    %68 = vector.shape_cast %67 : vector<1x1x384xf32> to vector<1x384xf32>
    %69 = arith.truncf %64 : vector<8x384xf32> to vector<8x384xbf16>
    %cst_52 = arith.constant dense<0.000000e+00> : vector<8x384xf32>
    %70 = tpu.matmul %69, %66, %cst_52 {dimension_numbers = #tpu.dot_dimension_numbers<[1], [0], [0], [1], [0, 0, 1, 1], [], []>} : vector<8x384xbf16>, vector<384x384xbf16>, vector<8x384xf32> -> vector<8x384xf32>
    %71 = vector.broadcast %68 : vector<1x384xf32> to vector<8x384xf32>
    %72 = arith.addf %70, %71 : vector<8x384xf32>
    %cst_53 = arith.constant 0.000000e+00 : f32
    %73 = vector.broadcast %cst_53 : f32 to vector<8x384xf32>
    %74 = arith.maximumf %72, %73 : vector<8x384xf32>
    %c1_54 = arith.constant 1 : index
    %c0_55 = arith.constant 0 : index
    %c0_56 = arith.constant 0 : index
    %75 = vector.load %arg10[%c1_54, %c0_55, %c0_56] : memref<2x384x384xbf16, #tpu.memory_space<vmem>>, vector<1x384x384xbf16>
    %76 = vector.shape_cast %75 : vector<1x384x384xbf16> to vector<384x384xbf16>
    %c1_57 = arith.constant 1 : index
    %c0_58 = arith.constant 0 : index
    %c0_59 = arith.constant 0 : index
    %77 = vector.load %arg11[%c1_57, %c0_58, %c0_59] : memref<2x1x384xf32, #tpu.memory_space<vmem>>, vector<1x1x384xf32>
    %78 = vector.shape_cast %77 : vector<1x1x384xf32> to vector<1x384xf32>
    %79 = arith.truncf %74 : vector<8x384xf32> to vector<8x384xbf16>
    %cst_60 = arith.constant dense<0.000000e+00> : vector<8x384xf32>
    %80 = tpu.matmul %79, %76, %cst_60 {dimension_numbers = #tpu.dot_dimension_numbers<[1], [0], [0], [1], [0, 0, 1, 1], [], []>} : vector<8x384xbf16>, vector<384x384xbf16>, vector<8x384xf32> -> vector<8x384xf32>
    %81 = vector.broadcast %78 : vector<1x384xf32> to vector<8x384xf32>
    %82 = arith.addf %80, %81 : vector<8x384xf32>
    %cst_61 = arith.constant 0.000000e+00 : f32
    %83 = vector.broadcast %cst_61 : f32 to vector<8x384xf32>
    %84 = arith.maximumf %82, %83 : vector<8x384xf32>
    %85 = arith.addf %64, %84 : vector<8x384xf32>
    %c0_62 = arith.constant 0 : index
    %c0_63 = arith.constant 0 : index
    %86 = vector.load %arg12[%c0_62, %c0_63] : memref<384x128xbf16, #tpu.memory_space<vmem>>, vector<384x128xbf16>
    %c0_64 = arith.constant 0 : index
    %c0_65 = arith.constant 0 : index
    %87 = vector.load %arg13[%c0_64, %c0_65] : memref<1x128xf32, #tpu.memory_space<vmem>>, vector<1x128xf32>
    %88 = arith.truncf %85 : vector<8x384xf32> to vector<8x384xbf16>
    %cst_66 = arith.constant dense<0.000000e+00> : vector<8x128xf32>
    %89 = tpu.matmul %88, %86, %cst_66 {dimension_numbers = #tpu.dot_dimension_numbers<[1], [0], [0], [1], [0, 0, 1, 1], [], []>} : vector<8x384xbf16>, vector<384x128xbf16>, vector<8x128xf32> -> vector<8x128xf32>
    %90 = vector.broadcast %87 : vector<1x128xf32> to vector<8x128xf32>
    %91 = arith.addf %89, %90 : vector<8x128xf32>
    %c0_67 = arith.constant 0 : index
    %c0_68 = arith.constant 0 : index
    %92 = vector.load %arg14[%c0_67, %c0_68] : memref<8x128xf32, #tpu.memory_space<vmem>>, vector<8x128xf32>
    tpu.vector_store %arg14[%c0_67, %c0_68], %91 {strides = array<i32>} : memref<8x128xf32, #tpu.memory_space<vmem>>, vector<8x128xf32>,
    return
  }
  func.func @transform_0(%arg0: i32) -> (i32, i32) {
    %c0_i32 = arith.constant 0 : i32
    %c0_i32_0 = arith.constant 0 : i32
    return %arg0, %c0_i32 : i32, i32
  }
  func.func @transform_1(%arg0: i32) -> (i32, i32) {
    %c0_i32 = arith.constant 0 : i32
    %c0_i32_0 = arith.constant 0 : i32
    %c0_i32_1 = arith.constant 0 : i32
    return %c0_i32, %c0_i32_0 : i32, i32
  }
  func.func @transform_2(%arg0: i32) -> (i32, i32) {
    %c0_i32 = arith.constant 0 : i32
    %c0_i32_0 = arith.constant 0 : i32
    %c0_i32_1 = arith.constant 0 : i32
    return %c0_i32, %c0_i32_0 : i32, i32
  }
  func.func @transform_3(%arg0: i32) -> (i32, i32, i32) {
    %c0_i32 = arith.constant 0 : i32
    %c0_i32_0 = arith.constant 0 : i32
    %c0_i32_1 = arith.constant 0 : i32
    %c0_i32_2 = arith.constant 0 : i32
    return %c0_i32, %c0_i32_0, %c0_i32_1 : i32, i32, i32
  }
  func.func @transform_4(%arg0: i32) -> (i32, i32, i32) {
    %c0_i32 = arith.constant 0 : i32
    %c0_i32_0 = arith.constant 0 : i32
    %c0_i32_1 = arith.constant 0 : i32
    %c0_i32_2 = arith.constant 0 : i32
    return %c0_i32, %c0_i32_0, %c0_i32_1 : i32, i32, i32
  }
  func.func @transform_5(%arg0: i32) -> (i32, i32) {
    %c0_i32 = arith.constant 0 : i32
    %c0_i32_0 = arith.constant 0 : i32
    %c0_i32_1 = arith.constant 0 : i32
    return %c0_i32, %c0_i32_0 : i32, i32
  }
  func.func @transform_6(%arg0: i32) -> (i32, i32) {
    %c0_i32 = arith.constant 0 : i32
    %c0_i32_0 = arith.constant 0 : i32
    %c0_i32_1 = arith.constant 0 : i32
    return %c0_i32, %c0_i32_0 : i32, i32
  }
  func.func @transform_7(%arg0: i32) -> (i32, i32) {
    %c0_i32 = arith.constant 0 : i32
    %c0_i32_0 = arith.constant 0 : i32
    %c0_i32_1 = arith.constant 0 : i32
    return %c0_i32, %c0_i32_0 : i32, i32
  }
  func.func @transform_8(%arg0: i32) -> (i32, i32) {
    %c0_i32 = arith.constant 0 : i32
    %c0_i32_0 = arith.constant 0 : i32
    %c0_i32_1 = arith.constant 0 : i32
    return %c0_i32, %c0_i32_0 : i32, i32
  }
  func.func @transform_9(%arg0: i32) -> (i32, i32, i32) {
    %c0_i32 = arith.constant 0 : i32
    %c0_i32_0 = arith.constant 0 : i32
    %c0_i32_1 = arith.constant 0 : i32
    %c0_i32_2 = arith.constant 0 : i32
    return %c0_i32, %c0_i32_0, %c0_i32_1 : i32, i32, i32
  }
  func.func @transform_10(%arg0: i32) -> (i32, i32, i32) {
    %c0_i32 = arith.constant 0 : i32
    %c0_i32_0 = arith.constant 0 : i32
    %c0_i32_1 = arith.constant 0 : i32
    %c0_i32_2 = arith.constant 0 : i32
    return %c0_i32, %c0_i32_0, %c0_i32_1 : i32, i32, i32
  }
  func.func @transform_11(%arg0: i32) -> (i32, i32) {
    %c0_i32 = arith.constant 0 : i32
    %c0_i32_0 = arith.constant 0 : i32
    %c0_i32_1 = arith.constant 0 : i32
    return %c0_i32, %c0_i32_0 : i32, i32
  }
  func.func @transform_12(%arg0: i32) -> (i32, i32) {
    %c0_i32 = arith.constant 0 : i32
    %c0_i32_0 = arith.constant 0 : i32
    %c0_i32_1 = arith.constant 0 : i32
    return %c0_i32, %c0_i32_0 : i32, i32
  }
  func.func @transform_13(%arg0: i32) -> (i32, i32) {
    %c0_i32 = arith.constant 0 : i32
    %c0_i32_0 = arith.constant 0 : i32
    return %arg0, %c0_i32 : i32, i32
  }
}

</mosaic_0001>

<bundles_post_ra>
// kernel: forward.1
= control target key start
LH: loop header
LB: loop body
LE: loop exit
PB: predicated region body
PF: predicated region fallthrough
CT: control target
= control target key end

     0   :  { %18 = vsyncpa [#allocation3], 0  ;;  %s4104_s0 = inlined_call_operand.hbm [shape: f32[8,32], index: 0, kind: input, shape index: {}]   ;;  %s4105_s1 = inlined_call_operand.hbm [shape: bf16[32,128], index: 1, kind: input, shape index: {}]   ;;  %s4106_s2 = inlined_call_operand.vmem [shape: f32[1,128], index: 2, kind: input, shape index: {}]   ;;  %s4107_s3 = inlined_call_operand.hbm [shape: bf16[4,128,128], index: 3, kind: input, shape index: {}]   ;;  %s4108_s4 = inlined_call_operand.vmem [shape: f32[4,1,128], index: 4, kind: input, shape index: {}]   ;;  %s4109_s5 = inlined_call_operand.hbm [shape: bf16[128,128], index: 5, kind: input, shape index: {}]   ;;  %s4110_s6 = inlined_call_operand.vmem [shape: f32[1,128], index: 6, kind: input, shape index: {}]   ;;  %s4111_s7 = inlined_call_operand.hbm [shape: bf16[128,384], index: 7, kind: input, shape index: {}]   ;;  %s4112_s8 = inlined_call_operand.vmem [shape: f32[1,384], index: 8, kind: input, shape index: {}]   ;;  %s4113_s9 = inlined_call_operand.hbm [shape: bf16[2,384,384], index: 9, kind: input, shape index: {}]   ;;  %s4114_s10 = inlined_call_operand.vmem [shape: f32[2,1,384], index: 10, kind: input, shape index: {}]   ;;  %s4115_s11 = inlined_call_operand.hbm [shape: bf16[384,128], index: 11, kind: input, shape index: {}]   ;;  %s4116_s12 = inlined_call_operand.vmem [shape: f32[1,128], index: 12, kind: input, shape index: {}]   ;;  %s4117_s13 = inlined_call_operand.vmem [shape: f32[8,128], index: 13, kind: output, shape index: {}]  }
   0x1   :  { %19 = vsyncpa [#allocation5], 0 }
   0x2   :  { %20 = vsyncpa [#allocation8], 0 }
   0x3   :  { %21 = vsyncpa [#allocation11], 0  ;;  %s3730_s25 = smov [#allocation4]   ;;  %s3568_s29 = scalar_lea.hbm %s4105_s1, 256 }
   0x4   :  { %s37_s26 = sshll.u32 %s3730_s25, 4  ;;  %p3569_p0 = scmp.ne.s32.totalorder %s4105_s1, %s3568_s29  ;;  %s38_s26 = int_to_ptr.vmem [resolvable:$true] %s37_s26 }
   0x5   :  { %p3572_p1 = scmp.lt.u32.totalorder %s3568_s29, %s4105_s1 }
   0x7   :  { %p3574_p2 = pnand %p3572_p1, %p3569_p0 }
   0x9   :  { %3577 = shalt.err (!%p3574_p2)
}
   0xa   :  { %s3578_s17 = scalar_lea.vmem %s38_s26, 256  ;;  %p3583_p4 = scmp.lt.s32.totalorder %s38_s26, %s38_s26 }
   0xb   :  { %p3579_p3 = scmp.ne.s32.totalorder %s38_s26, %s3578_s17  ;;  %p3584_p5 = scmp.lt.s32.totalorder %s3578_s17, %s3578_s17 }
   0xd   :  { %p3585_p6 = por %p3584_p5, %p3583_p4 }
   0xf   :  { %p3586_p7 = pnand %p3585_p6, %p3579_p3 }
  0x11   :  { %3589 = shalt.err (!%p3586_p7)
}
  0x12   :  { %s3731_s18 = smov 64   ;;  %s3732_s19 = smov 4  }
  0x13   :  { %43 = dma.hbm_to_vmem [thread:$0]  %s4105_s1, 256, %s38_s26, [#allocation5], %s3731_s18, %s3731_s18, %s3732_s19  }
  0x14   :  { %s3733_s22 = smov [#allocation7]   ;;  %s3590_s27 = scalar_lea.hbm %s4109_s5, 1024 }
  0x15   :  { %s65_s23 = sshll.u32 %s3733_s22, 4  ;;  %p3591_p8 = scmp.ne.s32.totalorder %s4109_s5, %s3590_s27  ;;  %s66_s23 = int_to_ptr.vmem [resolvable:$true] %s65_s23 }
  0x16   :  { %p3594_p9 = scmp.lt.u32.totalorder %s3590_s27, %s4109_s5 }
  0x18   :  { %p3596_p10 = pnand %p3594_p9, %p3591_p8 }
  0x1a   :  { %3599 = shalt.err (!%p3596_p10)
}
  0x1b   :  { %s3600_s15 = scalar_lea.vmem %s66_s23, 1024  ;;  %p3605_p12 = scmp.lt.s32.totalorder %s66_s23, %s66_s23 }
  0x1c   :  { %p3601_p11 = scmp.ne.s32.totalorder %s66_s23, %s3600_s15  ;;  %p3606_p13 = scmp.lt.s32.totalorder %s3600_s15, %s3600_s15 }
  0x1e   :  { %p3607_p0 = por %p3606_p13, %p3605_p12 }
  0x20   :  { %p3608_p1 = pnand %p3607_p0, %p3601_p11 }
  0x22   :  { %3611 = shalt.err (!%p3608_p1)
}
  0x23   :  { %71 = dma.hbm_to_vmem [thread:$0]  %s4109_s5, 1024, %s66_s23, [#allocation8], %s3731_s18, %s3731_s18, %s3732_s19  }
  0x24   :  { %s3734_s16 = smov [#allocation10]   ;;  %s3735_s20 = smov [#allocation2]  }
  0x25   :  { %s93_s17 = sshll.u32 %s3734_s16, 4  ;;  %s28_s21 = sshll.u32 %s3735_s20, 4  ;;  %s94_s17 = int_to_ptr.vmem [resolvable:$true] %s93_s17  ;;  %s29_s21 = int_to_ptr.vmem [resolvable:$true] %s28_s21 }
  0x26   :  { %s3612_s25 = scalar_lea.hbm %s4113_s9, 18432 }
  0x27   :  { %p3613_p2 = scmp.ne.s32.totalorder %s4113_s9, %s3612_s25  ;;  %p3616_p3 = scmp.lt.u32.totalorder %s3612_s25, %s4113_s9 }
  0x29   :  { %p3618_p4 = pnand %p3616_p3, %p3613_p2 }
  0x2b   :  { %3621 = shalt.err (!%p3618_p4)
}
  0x2c   :  { %s3622_s5 = scalar_lea.vmem %s94_s17, 18432  ;;  %p3627_p6 = scmp.lt.s32.totalorder %s94_s17, %s94_s17 }
  0x2d   :  { %p3623_p5 = scmp.ne.s32.totalorder %s94_s17, %s3622_s5  ;;  %p3628_p7 = scmp.lt.s32.totalorder %s3622_s5, %s3622_s5 }
  0x2f   :  { %p3629_p8 = por %p3628_p7, %p3627_p6 }
  0x31   :  { %p3630_p9 = pnand %p3629_p8, %p3623_p5 }
  0x33   :  { %3633 = shalt.err (!%p3630_p9)
}
  0x34   :  { %s3736_s23 = smov 192   ;;  %s3737_s14 = smov 12  }
  0x35   :  { %99 = dma.hbm_to_vmem [thread:$0]  %s4113_s9, 18432, %s94_s17, [#allocation11], %s3736_s23, %s3736_s23, %s3737_s14  }
  0x36   :  { %s3634_s20 = scalar_lea.hbm %s4104_s0, 128 }
  0x37   :  { %p3635_p10 = scmp.ne.s32.totalorder %s4104_s0, %s3634_s20  ;;  %p3638_p11 = scmp.lt.u32.totalorder %s3634_s20, %s4104_s0 }
  0x39   :  { %p3640_p12 = pnand %p3638_p11, %p3635_p10 }
  0x3b   :  { %3643 = shalt.err (!%p3640_p12)
}
  0x3c   :  { %s3644_s28 = scalar_lea.vmem %s29_s21, 128  ;;  %p3649_p0 = scmp.lt.s32.totalorder %s29_s21, %s29_s21 }
  0x3d   :  { %p3645_p13 = scmp.ne.s32.totalorder %s29_s21, %s3644_s28  ;;  %p3650_p1 = scmp.lt.s32.totalorder %s3644_s28, %s3644_s28 }
  0x3f   :  { %p3651_p2 = por %p3650_p1, %p3649_p0 }
  0x41   :  { %p3652_p3 = pnand %p3651_p2, %p3645_p13 }
  0x43   :  { %3655 = shalt.err (!%p3652_p3)
}
  0x44   :  { %31 = dma.hbm_to_vmem [thread:$0]  %s4104_s0, 128, %s29_s21, [#allocation3]  }
  0x45   :  { %s3738_s29 = smov [#allocation6]   ;;  %s3739_s5 = smov [#allocation9]  }
  0x46   :  { %s51_s30 = sshll.u32 %s3738_s29, 4  ;;  %s79_s15 = sshll.u32 %s3739_s5, 4  ;;  %s52_s30 = int_to_ptr.vmem [resolvable:$true] %s51_s30  ;;  %s3871_s15 = int_to_ptr.vmem [resolvable:$true] %s79_s15 }
  0x47   :  { %s3656_s16 = scalar_lea.hbm %s4107_s3, 4096 }
  0x48   :  { %p3657_p4 = scmp.ne.s32.totalorder %s4107_s3, %s3656_s16  ;;  %p3660_p5 = scmp.lt.u32.totalorder %s3656_s16, %s4107_s3 }
  0x4a   :  { %p3662_p6 = pnand %p3660_p5, %p3657_p4 }
  0x4c   :  { %3665 = shalt.err (!%p3662_p6)
}
  0x4d   :  { %s3666_s0 = scalar_lea.vmem %s52_s30, 4096  ;;  %p3671_p8 = scmp.lt.s32.totalorder %s52_s30, %s52_s30 }
  0x4e   :  { %p3667_p7 = scmp.ne.s32.totalorder %s52_s30, %s3666_s0  ;;  %p3672_p9 = scmp.lt.s32.totalorder %s3666_s0, %s3666_s0 }
  0x50   :  { %p3673_p10 = por %p3672_p9, %p3671_p8 }
  0x52   :  { %p3674_p11 = pnand %p3673_p10, %p3667_p7 }
  0x54   :  { %3677 = shalt.err (!%p3674_p11)
}
  0x55   :  { %57 = dma.hbm_to_vmem [thread:$0]  %s4107_s3, 4096, %s52_s30, [#allocation5], %s3731_s18, %s3731_s18, %s3732_s19  }
  0x56   :  { %s3678_s17 = scalar_lea.hbm %s4111_s7, 3072 }
  0x57   :  { %p3679_p12 = scmp.ne.s32.totalorder %s4111_s7, %s3678_s17  ;;  %p3682_p13 = scmp.lt.u32.totalorder %s3678_s17, %s4111_s7 }
  0x59   :  { %p3684_p0 = pnand %p3682_p13, %p3679_p12 }
  0x5b   :  { %3687 = shalt.err (!%p3684_p0)
}
  0x5c   :  { %s3688_s16 = scalar_lea.vmem %s3871_s15, 3072  ;;  %p3693_p2 = scmp.lt.s32.totalorder %s3871_s15, %s3871_s15 }
  0x5d   :  { %p3689_p1 = scmp.ne.s32.totalorder %s3871_s15, %s3688_s16  ;;  %p3694_p3 = scmp.lt.s32.totalorder %s3688_s16, %s3688_s16 }
  0x5f   :  { %p3695_p4 = por %p3694_p3, %p3693_p2 }
  0x61   :  { %p3696_p5 = pnand %p3695_p4, %p3689_p1 }
  0x63   :  { %3699 = shalt.err (!%p3696_p5)
}
  0x64   :  { %85 = dma.hbm_to_vmem [thread:$0]  %s4111_s7, 3072, %s3871_s15, [#allocation8], %s3736_s23, %s3736_s23, %s3737_s14  }
  0x65   :  { %s3740_s20 = smov [#allocation12]   ;;  %s3700_s0 = scalar_lea.hbm %s4115_s11, 3072 }
  0x66   :  { %s107_s22 = sshll.u32 %s3740_s20, 4  ;;  %p3701_p6 = scmp.ne.s32.totalorder %s4115_s11, %s3700_s0  ;;  %s108_s22 = int_to_ptr.vmem [resolvable:$true] %s107_s22 }
  0x67   :  { %p3704_p7 = scmp.lt.u32.totalorder %s3700_s0, %s4115_s11 }
  0x69   :  { %p3706_p8 = pnand %p3704_p7, %p3701_p6 }
  0x6b   :  { %3709 = shalt.err (!%p3706_p8)
}
  0x6c   :  { %s3710_s17 = scalar_lea.vmem %s108_s22, 3072  ;;  %p3715_p10 = scmp.lt.s32.totalorder %s108_s22, %s108_s22 }
  0x6d   :  { %p3711_p9 = scmp.ne.s32.totalorder %s108_s22, %s3710_s17  ;;  %p3716_p11 = scmp.lt.s32.totalorder %s3710_s17, %s3710_s17 }
  0x6f   :  { %p3717_p12 = por %p3716_p11, %p3715_p10 }
  0x71   :  { %p3718_p13 = pnand %p3717_p12, %p3711_p9 }
  0x73   :  { %3721 = shalt.err (!%p3718_p13)
}
  0x74   :  { %113 = dma.hbm_to_vmem [thread:$0]  %s4115_s11, 3072, %s108_s22, [#allocation11], %s3731_s18, %s3731_s18, %s3732_s19  }
  0x75   :  { %3722 = dma.done.wait [#allocation3], 128  }
  0x76   :  { %3723 = vsyncadd [#allocation3], 4294967168 }
  0x77   :  { %3724 = dma.done.wait [#allocation5], 4352  }
  0x78   :  { %3725 = vsyncadd [#allocation5], 4294962944 }
  0x79   :  { %3726 = dma.done.wait [#allocation8], 4096  }
  0x7a   :  { %3727 = vsyncadd [#allocation8], 4294963200 }
  0x7b   :  { %3728 = dma.done.wait [#allocation11], 21504  }
  0x7c   :  { %3729 = vsyncadd [#allocation11], 4294945792  ;;  %v3741_v0 = vmov 0.0   ;;  %vm3742_vm0 = vmmov 0   ;;  %v3278_v1 = vld [vmem:[#allocation4] sm:$0xff]   ;;  %v3279_v2 = vld [vmem:[#allocation4 + $0x8] sm:$0xff]  }
  0x7d   :  { %3064 = vmatprep.subr.bf16.mxu0 %v3741_v0  ;;  %3068 = vmatprep.mubr.msk.bf16.mxu0 %vm3742_vm0, %v3741_v0  ;;  %v138_v3 = vld [vmem:[#allocation2] sm:$0xff]  ;;  %v3280_v4 = vld [vmem:[#allocation6] sm:$0xff]   ;;  %vm163_vm1 = vcmask 261120   ;;  %v3282_v7 = vld [vmem:[#allocation6 + $0x10] sm:$0xff]  }
  0x7e   :  { %3072 = vmatprep.subr.bf16.mxu1 %v3741_v0  ;;  %3088 = vmatprep.mubr.msk.bf16.mxu1 %vm3742_vm0, %v3741_v0  ;;  %v144_v5 = vpack.c.bf16 %v138_v3, %v138_v3  ;;  %v3281_v6 = vld [vmem:[#allocation6 + $0x8] sm:$0xff]   ;;  %v3283_v8 = vld [vmem:[#allocation6 + $0x18] sm:$0xff]   ;;  %v3284_v9 = vld [vmem:[#allocation6 + $0x20] sm:$0xff]  }
  0x7f   :  { %3065 = vmatpush3.bf16.msra.mxu0 %v3278_v1  ;;  %3073 = vmatpush3.bf16.msra.mxu1 %v3280_v4  ;;  %v3285_v10 = vld [vmem:[#allocation6 + $0x28] sm:$0xff]   ;;  %v3286_v11 = vld [vmem:[#allocation6 + $0x30] sm:$0xff]   ;;  %v3287_v12 = vld [vmem:[#allocation6 + $0x38] sm:$0xff]  }
  0x80   :  { %3066 = vmatprep.subr.bf16.mxu0 %v3741_v0  ;;  %3074 = vmatprep.subr.bf16.mxu1 %v3741_v0  ;;  %v3288_v13 = vld [vmem:[#allocation6 + $0x40] sm:$0xff]   ;;  %v3289_v14 = vld [vmem:[#allocation6 + $0x48] sm:$0xff]   ;;  %v3290_v15 = vld [vmem:[#allocation6 + $0x50] sm:$0xff]  }
  0x81   :  { %v3291_v16 = vld [vmem:[#allocation6 + $0x58] sm:$0xff]   ;;  %v3292_v17 = vld [vmem:[#allocation6 + $0x60] sm:$0xff]   ;;  %v3293_v18 = vld [vmem:[#allocation6 + $0x68] sm:$0xff]  }
  0x82   :  { %v2668_v19 = vld [vmem:[%s4106_s2] ss:$0 sm:$0xff]  ;;  %v3294_v27 = vld [vmem:[#allocation6 + $0x70] sm:$0xff]   ;;  %v3295_v28 = vld [vmem:[#allocation6 + $0x78] sm:$0xff]  }
  0x83   :  { %3067 = vmatpush3.bf16.msra.mxu0 %v3279_v2  ;;  %3075 = vmatpush3.bf16.msra.mxu1 %v3281_v6  ;;  %v3296_v29 = vld [vmem:[#allocation6 + $0x80] sm:$0xff]   ;;  %v3297_v30 = vld [vmem:[#allocation6 + $0x88] sm:$0xff]   ;;  %v3298_v31 = vld [vmem:[#allocation6 + $0x90] sm:$0xff]  }
  0x84   :  { %3092 = vmatprep.subr.bf16.mxu0 %v3741_v0  ;;  %3076 = vmatprep.subr.bf16.mxu1 %v3741_v0  ;;  %v3299_v32 = vld [vmem:[#allocation6 + $0x98] sm:$0xff]   ;;  %v3300_v33 = vld [vmem:[#allocation6 + $0xa0] sm:$0xff]   ;;  %v3301_v34 = vld [vmem:[#allocation6 + $0xa8] sm:$0xff]  }
  0x85   :  { %v2672_v35 = vld [vmem:[%s4108_s4] ss:$0 sm:$0xff]  ;;  %v3302_v43 = vld [vmem:[#allocation6 + $0xb0] sm:$0xff]   ;;  %v3303_v44 = vld [vmem:[#allocation6 + $0xb8] sm:$0xff]  }
  0x86   :  { %3069 = vmatmul.mubr.msk.bf16.vlgmr.msra.gmra.mrb[0].mxu0 %vm163_vm1, %v144_v5  ;;  %v3304_v45 = vld [vmem:[#allocation6 + $0xc0] sm:$0xff]   ;;  %v3305_v46 = vld [vmem:[#allocation6 + $0xc8] sm:$0xff]   ;;  %v3306_v47 = vld [vmem:[#allocation6 + $0xd0] sm:$0xff]  }
  0x87   :  { %3108 = vmatprep.mubr.msk.bf16.mxu0 %vm3742_vm0, %v3741_v0  ;;  %3077 = vmatpush3.bf16.msra.mxu1 %v3282_v7  ;;  %v3307_v48 = vld [vmem:[#allocation6 + $0xd8] sm:$0xff]   ;;  %v3308_v49 = vld [vmem:[#allocation6 + $0xe0] sm:$0xff]   ;;  %v3309_v50 = vld [vmem:[#allocation6 + $0xe8] sm:$0xff]  }
  0x88   :  { %3078 = vmatprep.subr.bf16.mxu1 %v3741_v0  ;;  %3093 = vmatpush3.bf16.msra.mxu0 %v3288_v13  ;;  %v2682_v51 = vld [vmem:[%s4108_s4 + $0x1] ss:$0 sm:$0xff]  ;;  %v3310_v60 = vld [vmem:[#allocation6 + $0xf0] sm:$0xff]   ;;  %v3311_v61 = vld [vmem:[#allocation6 + $0xf8] sm:$0xff]  }
  0x89   :  { %3094 = vmatprep.subr.bf16.mxu0 %v3741_v0  ;;  %v3312_v62 = vld [vmem:[#allocation7] sm:$0xff]   ;;  %v3313_v63 = vld [vmem:[#allocation7 + $0x8] sm:$0xff]   ;;  %v3314_v1 = vld [vmem:[#allocation7 + $0x10] sm:$0xff]  }
  0x8a   :  { %v3315_v2 = vld [vmem:[#allocation7 + $0x18] sm:$0xff]   ;;  %v3316_v3 = vld [vmem:[#allocation7 + $0x20] sm:$0xff]   ;;  %v3317_v4 = vld [vmem:[#allocation7 + $0x28] sm:$0xff]  }
  0x8b   :  { %3079 = vmatpush3.bf16.msra.mxu1 %v3283_v8  ;;  %v2692_v5 = vld [vmem:[%s4108_s4 + $0x2] ss:$0 sm:$0xff]  ;;  %v3318_v13 = vld [vmem:[#allocation7 + $0x30] sm:$0xff]  }
  0x8c   :  { %3080 = vmatprep.subr.bf16.mxu1 %v3741_v0  ;;  %3095 = vmatpush3.bf16.msra.mxu0 %v3289_v14  ;;  %v3319_v14 = vld [vmem:[#allocation7 + $0x38] sm:$0xff]  }
  0x8d   :  { %3096 = vmatprep.subr.bf16.mxu0 %v3741_v0 }
  0x8f   :  { %3081 = vmatpush3.bf16.msra.mxu1 %v3284_v9 }
  0x90   :  { %3082 = vmatprep.subr.bf16.mxu1 %v3741_v0  ;;  %3097 = vmatpush3.bf16.msra.mxu0 %v3290_v15  ;;  %v3320_v15 = vld [vmem:[#allocation9] ss:$12 sps:$4 sm:$0xff]  }
  0x91   :  { %3098 = vmatprep.subr.bf16.mxu0 %v3741_v0 }
  0x93   :  { %3083 = vmatpush3.bf16.msra.mxu1 %v3285_v10 }
  0x94   :  { %3084 = vmatprep.subr.bf16.mxu1 %v3741_v0  ;;  %3099 = vmatpush3.bf16.msra.mxu0 %v3291_v16  ;;  %v3322_v16 = vld [vmem:[#allocation9 + $0x4] ss:$12 sps:$4 sm:$0xff]  }
  0x95   :  { %3100 = vmatprep.subr.bf16.mxu0 %v3741_v0 }
  0x97   :  { %3085 = vmatpush3.bf16.msra.mxu1 %v3286_v11 }
  0x98   :  { %3086 = vmatprep.subr.bf16.mxu1 %v3741_v0  ;;  %3101 = vmatpush3.bf16.msra.mxu0 %v3292_v17  ;;  %v3326_v17 = vld [vmem:[#allocation9 + $0x1c] ss:$12 sps:$4 sm:$0xff]  }
  0x99   :  { %3102 = vmatprep.subr.bf16.mxu0 %v3741_v0 }
  0x9b   :  { %3087 = vmatpush3.bf16.msra.mxu1 %v3287_v12 }
  0x9c   :  { %3112 = vmatprep.subr.bf16.mxu1 %v3741_v0  ;;  %3103 = vmatpush3.bf16.msra.mxu0 %v3293_v18  ;;  %v3324_v18 = vld [vmem:[#allocation9 + $0x18] ss:$12 sps:$4 sm:$0xff]  }
  0x9d   :  { %3104 = vmatprep.subr.bf16.mxu0 %v3741_v0 }
  0xa0   :  { %3105 = vmatpush3.bf16.msra.mxu0 %v3294_v27  ;;  %v3346_v27 = vld [vmem:[#allocation9 + $0x94] ss:$12 sps:$4 sm:$0xff]  }
  0xa1   :  { %3106 = vmatprep.subr.bf16.mxu0 %v3741_v0 }
  0xa4   :  { %3107 = vmatpush3.bf16.msra.mxu0 %v3295_v28  ;;  %v3344_v28 = vld [vmem:[#allocation9 + $0x90] ss:$12 sps:$4 sm:$0xff]  }
  0xa5   :  { %3132 = vmatprep.subr.bf16.mxu0 %v3741_v0 }
 0x159   :  { %v201_v20 = vpop.f32.mrb[0].mxu0 }
 0x15a   :  { %v202_v21 = vadd.f32 %v2668_v19, %v201_v20  ;;  %v3070_v22 = vpop.f32.mrb[1].mxu0  ;;  %v3330_v19 = vld [vmem:[#allocation9 + $0x34] ss:$12 sps:$4 sm:$0xff]   ;;  %v3328_v20 = vld [vmem:[#allocation9 + $0x30] ss:$12 sps:$4 sm:$0xff]  }
 0x15b   :  { %v204_v23 = vpop.f32.mrb[2].mxu0  ;;  %v3332_v22 = vld [vmem:[#allocation9 + $0x48] ss:$12 sps:$4 sm:$0xff]  }
 0x15c   :  { %v3950_v24 = vmax.f32 %v202_v21, 0.0  ;;  %v3071_v25 = vpop.f32.mrb[3].mxu0  ;;  %v3334_v21 = vld [vmem:[#allocation9 + $0x4c] ss:$12 sps:$4 sm:$0xff]   ;;  %v3338_v23 = vld [vmem:[#allocation9 + $0x64] ss:$12 sps:$4 sm:$0xff]  }
 0x15d   :  { %v3342_v25 = vld [vmem:[#allocation9 + $0x7c] ss:$12 sps:$4 sm:$0xff]  }
 0x15e   :  { %v225_v26 = vpack.c.bf16 %v3950_v24, %v3950_v24 }
 0x160   :  { %3089 = vmatmul.mubr.bf16.vlgmr.msra.gmra.mrb[0].mxu1 %v225_v26  ;;  %v3340_v26 = vld [vmem:[#allocation9 + $0x78] ss:$12 sps:$4 sm:$0xff]  }
 0x161   :  { %3128 = vmatprep.mubr.msk.bf16.mxu1 %vm3742_vm0, %v3741_v0  ;;  %3113 = vmatpush3.bf16.msra.mxu1 %v3296_v29  ;;  %v2702_v29 = vld [vmem:[%s4108_s4 + $0x3] ss:$0 sm:$0xff] }
 0x162   :  { %3114 = vmatprep.subr.bf16.mxu1 %v3741_v0 }
 0x165   :  { %3115 = vmatpush3.bf16.msra.mxu1 %v3297_v30 }
 0x166   :  { %3116 = vmatprep.subr.bf16.mxu1 %v3741_v0 }
 0x169   :  { %3117 = vmatpush3.bf16.msra.mxu1 %v3298_v31 }
 0x16a   :  { %3118 = vmatprep.subr.bf16.mxu1 %v3741_v0 }
 0x16d   :  { %3119 = vmatpush3.bf16.msra.mxu1 %v3299_v32 }
 0x16e   :  { %3120 = vmatprep.subr.bf16.mxu1 %v3741_v0 }
 0x171   :  { %3121 = vmatpush3.bf16.msra.mxu1 %v3300_v33 }
 0x172   :  { %3122 = vmatprep.subr.bf16.mxu1 %v3741_v0 }
 0x175   :  { %3123 = vmatpush3.bf16.msra.mxu1 %v3301_v34 }
 0x176   :  { %3124 = vmatprep.subr.bf16.mxu1 %v3741_v0 }
 0x179   :  { %3125 = vmatpush3.bf16.msra.mxu1 %v3302_v43  ;;  %v3343_v43 = vld [vmem:[#allocation9 + $0x80] ss:$12 sps:$4 sm:$0xff]  }
 0x17a   :  { %3126 = vmatprep.subr.bf16.mxu1 %v3741_v0 }
 0x17d   :  { %3127 = vmatpush3.bf16.msra.mxu1 %v3303_v44  ;;  %v3347_v44 = vld [vmem:[#allocation9 + $0x98] ss:$12 sps:$4 sm:$0xff]  }
 0x17e   :  { %3152 = vmatprep.subr.bf16.mxu1 %v3741_v0 }
 0x233   :  { %v314_v36 = vpop.f32.mrb[0].mxu1 }
 0x234   :  { %v315_v37 = vadd.f32 %v2672_v35, %v314_v36  ;;  %v3090_v38 = vpop.f32.mrb[1].mxu1 }
 0x235   :  { %v317_v39 = vpop.f32.mrb[2].mxu1 }
 0x236   :  { %v320_v40 = vmax.f32 %v315_v37, 0.0  ;;  %v3091_v41 = vpop.f32.mrb[3].mxu1  ;;  %v3323_v37 = vld [vmem:[#allocation9 + $0x8] ss:$12 sps:$4 sm:$0xff]   ;;  %v3327_v39 = vld [vmem:[#allocation9 + $0x20] ss:$12 sps:$4 sm:$0xff]  }
 0x237   :  { %v3335_v41 = vld [vmem:[#allocation9 + $0x50] ss:$12 sps:$4 sm:$0xff]  }
 0x238   :  { %v340_v42 = vpack.c.bf16 %v320_v40, %v320_v40  ;;  %v3331_v40 = vld [vmem:[#allocation9 + $0x38] ss:$12 sps:$4 sm:$0xff]  }
 0x23a   :  { %3109 = vmatmul.mubr.bf16.vlgmr.msra.gmra.mrb[4].mxu0 %v340_v42  ;;  %v3339_v42 = vld [vmem:[#allocation9 + $0x68] ss:$12 sps:$4 sm:$0xff]  }
 0x23b   :  { %3148 = vmatprep.mubr.msk.bf16.mxu0 %vm3742_vm0, %v3741_v0  ;;  %3133 = vmatpush3.bf16.msra.mxu0 %v3304_v45  ;;  %v3350_v45 = vld [vmem:[#allocation9 + $0xac] ss:$12 sps:$4 sm:$0xff]  }
 0x23c   :  { %3134 = vmatprep.subr.bf16.mxu0 %v3741_v0 }
 0x23f   :  { %3135 = vmatpush3.bf16.msra.mxu0 %v3305_v46  ;;  %v3348_v46 = vld [vmem:[#allocation9 + $0xa8] ss:$12 sps:$4 sm:$0xff]  }
 0x240   :  { %3136 = vmatprep.subr.bf16.mxu0 %v3741_v0 }
 0x243   :  { %3137 = vmatpush3.bf16.msra.mxu0 %v3306_v47  ;;  %v3351_v47 = vld [vmem:[#allocation9 + $0xb0] ss:$12 sps:$4 sm:$0xff]  }
 0x244   :  { %3138 = vmatprep.subr.bf16.mxu0 %v3741_v0 }
 0x247   :  { %3139 = vmatpush3.bf16.msra.mxu0 %v3307_v48  ;;  %v3743_v48 = vmov 0  }
 0x248   :  { %3140 = vmatprep.subr.bf16.mxu0 %v3741_v0 }
 0x24b   :  { %3141 = vmatpush3.bf16.msra.mxu0 %v3308_v49  ;;  %v3354_v49 = vld [vmem:[#allocation10 + $0x4] ss:$12 sps:$4 sm:$0xff]  }
 0x24c   :  { %3142 = vmatprep.subr.bf16.mxu0 %v3741_v0 }
 0x24f   :  { %3143 = vmatpush3.bf16.msra.mxu0 %v3309_v50  ;;  %v3379_v50 = vld [vmem:[#allocation10 + $0xc8] ss:$12 sps:$4 sm:$0xff]  }
 0x250   :  { %3144 = vmatprep.subr.bf16.mxu0 %v3741_v0 }
 0x253   :  { %3145 = vmatpush3.bf16.msra.mxu0 %v3310_v60  ;;  %v3357_v60 = vld [vmem:[#allocation10 + $0x1c] ss:$12 sps:$4 sm:$0xff]  }
 0x254   :  { %3146 = vmatprep.subr.bf16.mxu0 %v3741_v0 }
 0x257   :  { %3147 = vmatpush3.bf16.msra.mxu0 %v3311_v61  ;;  %v3384_v61 = vld [vmem:[#allocation10 + $0xe0] ss:$12 sps:$4 sm:$0xff]  }
 0x258   :  { %958 = vmatprep.subr.bf16.mxu0 %v3322_v16  ;;  %v3405_v16 = vld [vmem:[#allocation10 + $0x80] ss:$12 sps:$4 sm:$0xff]  }
 0x30d   :  { %v429_v52 = vpop.f32.mrb[4].mxu0 }
 0x30e   :  { %v430_v53 = vadd.f32 %v2682_v51, %v429_v52  ;;  %v3110_v54 = vpop.f32.mrb[5].mxu0  ;;  %v2711_v51 = vld [vmem:[%s4110_s6] ss:$0 sm:$0xff] }
 0x30f   :  { %v432_v55 = vpop.f32.mrb[6].mxu0 }
 0x310   :  { %v435_v56 = vmax.f32 %v430_v53, 0.0  ;;  %v3111_v57 = vpop.f32.mrb[7].mxu0 }
 0x311   :  { %v3380_v57 = vld [vmem:[#allocation10 + $0x8] ss:$12 sps:$4 sm:$0xff]  }
 0x312   :  { %v3981_v58 = vadd.f32 %v435_v56, %v3950_v24  ;;  %v3336_v24 = vld [vmem:[#allocation9 + $0x60] ss:$12 sps:$4 sm:$0xff]  }
 0x313   :  { %v3352_v56 = vld [vmem:[#allocation10] ss:$12 sps:$4 sm:$0xff]  }
 0x314   :  { %v456_v59 = vpack.c.bf16 %v3981_v58, %v3981_v58 }
 0x316   :  { %3129 = vmatmul.mubr.bf16.vlgmr.msra.gmra.mrb[4].mxu1 %v456_v59 }
 0x317   :  { %3168 = vmatprep.mubr.msk.bf16.mxu1 %vm3742_vm0, %v3741_v0  ;;  %3153 = vmatpush3.bf16.msra.mxu1 %v3312_v62  ;;  %v3355_v62 = vld [vmem:[#allocation10 + $0x18] ss:$12 sps:$4 sm:$0xff]  }
 0x318   :  { %3154 = vmatprep.subr.bf16.mxu1 %v3741_v0 }
 0x31b   :  { %3155 = vmatpush3.bf16.msra.mxu1 %v3313_v63  ;;  %v3385_v63 = vld [vmem:[#allocation10 + $0x20] ss:$12 sps:$4 sm:$0xff]  }
 0x31c   :  { %3156 = vmatprep.subr.bf16.mxu1 %v3741_v0 }
 0x31f   :  { %3157 = vmatpush3.bf16.msra.mxu1 %v3314_v1  ;;  %v3360_v1 = vld [vmem:[#allocation10 + $0x34] ss:$12 sps:$4 sm:$0xff]  }
 0x320   :  { %3158 = vmatprep.subr.bf16.mxu1 %v3741_v0 }
 0x323   :  { %3159 = vmatpush3.bf16.msra.mxu1 %v3315_v2  ;;  %v3389_v2 = vld [vmem:[#allocation10 + $0xf8] ss:$12 sps:$4 sm:$0xff]  }
 0x324   :  { %3160 = vmatprep.subr.bf16.mxu1 %v3741_v0 }
 0x327   :  { %3161 = vmatpush3.bf16.msra.mxu1 %v3316_v3  ;;  %v3358_v3 = vld [vmem:[#allocation10 + $0x30] ss:$12 sps:$4 sm:$0xff]  }
 0x328   :  { %3162 = vmatprep.subr.bf16.mxu1 %v3741_v0 }
 0x32b   :  { %3163 = vmatpush3.bf16.msra.mxu1 %v3317_v4  ;;  %v3390_v4 = vld [vmem:[#allocation10 + $0x38] ss:$12 sps:$4 sm:$0xff]  }
 0x32c   :  { %3164 = vmatprep.subr.bf16.mxu1 %v3741_v0 }
 0x32f   :  { %3165 = vmatpush3.bf16.msra.mxu1 %v3318_v13  ;;  %v3369_v13 = vld [vmem:[#allocation10 + $0x7c] ss:$12 sps:$4 sm:$0xff]  }
 0x330   :  { %3166 = vmatprep.subr.bf16.mxu1 %v3741_v0 }
 0x333   :  { %3167 = vmatpush3.bf16.msra.mxu1 %v3319_v14  ;;  %v3404_v14 = vld [vmem:[#allocation10 + $0x140] ss:$12 sps:$4 sm:$0xff]  }
 0x334   :  { %3172 = vmatprep.subr.bf16.mxu1 %v3741_v0 }
 0x3e9   :  { %v545_v6 = vpop.f32.mrb[4].mxu1 }
 0x3ea   :  { %v546_v7 = vadd.f32 %v2692_v5, %v545_v6  ;;  %v3130_v8 = vpop.f32.mrb[5].mxu1  ;;  %v3363_v5 = vld [vmem:[#allocation10 + $0x4c] ss:$12 sps:$4 sm:$0xff]   ;;  %v3394_v6 = vld [vmem:[#allocation10 + $0x110] ss:$12 sps:$4 sm:$0xff]  }
 0x3eb   :  { %v548_v9 = vpop.f32.mrb[6].mxu1  ;;  %v3395_v8 = vld [vmem:[#allocation10 + $0x50] ss:$12 sps:$4 sm:$0xff]  }
 0x3ec   :  { %v551_v10 = vmax.f32 %v546_v7, 0.0  ;;  %v3131_v11 = vpop.f32.mrb[7].mxu1  ;;  %v3361_v7 = vld [vmem:[#allocation10 + $0x48] ss:$12 sps:$4 sm:$0xff]   ;;  %v3366_v9 = vld [vmem:[#allocation10 + $0x64] ss:$12 sps:$4 sm:$0xff]  }
 0x3ed   :  { %v3364_v11 = vld [vmem:[#allocation10 + $0x60] ss:$12 sps:$4 sm:$0xff]  }
 0x3ee   :  { %v571_v12 = vpack.c.bf16 %v551_v10, %v551_v10  ;;  %v3399_v10 = vld [vmem:[#allocation10 + $0x128] ss:$12 sps:$4 sm:$0xff]  }
 0x3f0   :  { %3149 = vmatmul.mubr.bf16.vlgmr.msra.gmra.mrb[8].mxu0 %v571_v12  ;;  %v3400_v12 = vld [vmem:[#allocation10 + $0x68] ss:$12 sps:$4 sm:$0xff]  }
 0x3f1   :  { %959 = vmatpush1.bf16.msra.mxu0 %v3320_v15  ;;  %990 = vmatprep.mubr.bf16.mxu0 %v3743_v48  ;;  %v3367_v15 = vld [vmem:[#allocation10 + $0x78] ss:$12 sps:$4 sm:$0xff]  }
 0x3f2   :  { %960 = vmatprep.subr.bf16.mxu0 %v3326_v17  ;;  %v3372_v17 = vld [vmem:[#allocation10 + $0x94] ss:$12 sps:$4 sm:$0xff]  }
 0x3f5   :  { %961 = vmatpush1.bf16.msra.mxu0 %v3324_v18  ;;  %v3370_v18 = vld [vmem:[#allocation10 + $0x90] ss:$12 sps:$4 sm:$0xff]  }
 0x3f6   :  { %962 = vmatprep.subr.bf16.mxu0 %v3330_v19  ;;  %v3375_v19 = vld [vmem:[#allocation10 + $0xac] ss:$12 sps:$4 sm:$0xff]  }
 0x3f9   :  { %963 = vmatpush1.bf16.msra.mxu0 %v3328_v20  ;;  %v3373_v20 = vld [vmem:[#allocation10 + $0xa8] ss:$12 sps:$4 sm:$0xff]  }
 0x3fa   :  { %964 = vmatprep.subr.bf16.mxu0 %v3334_v21  ;;  %v3378_v21 = vld [vmem:[#allocation10 + $0xc4] ss:$12 sps:$4 sm:$0xff]  }
 0x3fd   :  { %965 = vmatpush1.bf16.msra.mxu0 %v3332_v22  ;;  %v3376_v22 = vld [vmem:[#allocation10 + $0xc0] ss:$12 sps:$4 sm:$0xff]  }
 0x3fe   :  { %966 = vmatprep.subr.bf16.mxu0 %v3338_v23  ;;  %v3383_v23 = vld [vmem:[#allocation10 + $0xdc] ss:$12 sps:$4 sm:$0xff]  }
 0x401   :  { %967 = vmatpush1.bf16.msra.mxu0 %v3336_v24  ;;  %v3381_v24 = vld [vmem:[#allocation10 + $0xd8] ss:$12 sps:$4 sm:$0xff]  }
 0x402   :  { %968 = vmatprep.subr.bf16.mxu0 %v3342_v25  ;;  %v3388_v25 = vld [vmem:[#allocation10 + $0xf4] ss:$12 sps:$4 sm:$0xff]  }
 0x405   :  { %969 = vmatpush1.bf16.msra.mxu0 %v3340_v26  ;;  %v3386_v26 = vld [vmem:[#allocation10 + $0xf0] ss:$12 sps:$4 sm:$0xff]  }
 0x406   :  { %970 = vmatprep.subr.bf16.mxu0 %v3346_v27  ;;  %v3393_v27 = vld [vmem:[#allocation10 + $0x10c] ss:$12 sps:$4 sm:$0xff]  }
 0x409   :  { %971 = vmatpush1.bf16.msra.mxu0 %v3344_v28  ;;  %v3391_v28 = vld [vmem:[#allocation10 + $0x108] ss:$12 sps:$4 sm:$0xff]  }
 0x40a   :  { %972 = vmatprep.subr.bf16.mxu0 %v3350_v45  ;;  %v4022_v45 = vld [vmem:[%s4112_s8] sm:$0x7] }
 0x40d   :  { %973 = vmatpush1.bf16.msra.mxu0 %v3348_v46 }
 0x40e   :  { %1542 = vmatprep.subr.bf16.mxu0 %v3354_v49 }
 0x4c3   :  { %v660_v30 = vpop.f32.mrb[8].mxu0 }
 0x4c4   :  { %v661_v31 = vadd.f32 %v2702_v29, %v660_v30  ;;  %v3150_v32 = vpop.f32.mrb[9].mxu0  ;;  %v3398_v29 = vld [vmem:[#allocation10 + $0x124] ss:$12 sps:$4 sm:$0xff]   ;;  %v3396_v30 = vld [vmem:[#allocation10 + $0x120] ss:$12 sps:$4 sm:$0xff]  }
 0x4c5   :  { %v663_v33 = vpop.f32.mrb[10].mxu0  ;;  %v3401_v32 = vld [vmem:[#allocation10 + $0x138] ss:$12 sps:$4 sm:$0xff]  }
 0x4c6   :  { %v666_v34 = vmax.f32 %v661_v31, 0.0  ;;  %v3151_v35 = vpop.f32.mrb[11].mxu0  ;;  %v3403_v31 = vld [vmem:[#allocation10 + $0x13c] ss:$12 sps:$4 sm:$0xff]   ;;  %v3408_v33 = vld [vmem:[#allocation10 + $0x154] ss:$12 sps:$4 sm:$0xff]  }
 0x4c7   :  { %v3406_v35 = vld [vmem:[#allocation10 + $0x150] ss:$12 sps:$4 sm:$0xff]  }
 0x4c8   :  { %v667_v36 = vadd.f32 %v666_v34, %v3981_v58  ;;  %v3409_v34 = vld [vmem:[#allocation10 + $0x158] ss:$12 sps:$4 sm:$0xff]  }
 0x4ca   :  { %v685_v38 = vpack.c.bf16 %v667_v36, %v667_v36  ;;  %v3410_v36 = vld [vmem:[#allocation10 + $0x98] ss:$12 sps:$4 sm:$0xff]  }
 0x4cc   :  { %3169 = vmatmul.mubr.bf16.vlgmr.msra.gmra.mrb[8].mxu1 %v685_v38  ;;  %v3414_v38 = vld [vmem:[#allocation10 + $0x170] ss:$12 sps:$4 sm:$0xff]  }
 0x4cd   :  { %3173 = vmatpush3.bf16.msra.mxu1 %v3323_v37  ;;  %3188 = vmatprep.mubr.msk.bf16.mxu1 %vm3742_vm0, %v3741_v0  ;;  %v3413_v37 = vld [vmem:[#allocation10 + $0x16c] ss:$12 sps:$4 sm:$0xff]  }
 0x4ce   :  { %3174 = vmatprep.subr.bf16.mxu1 %v3741_v0 }
 0x4d1   :  { %3175 = vmatpush3.bf16.msra.mxu1 %v3327_v39  ;;  %v3411_v39 = vld [vmem:[#allocation10 + $0x168] ss:$12 sps:$4 sm:$0xff]  }
 0x4d2   :  { %3176 = vmatprep.subr.bf16.mxu1 %v3741_v0 }
 0x4d5   :  { %3177 = vmatpush3.bf16.msra.mxu1 %v3331_v40  ;;  %v3415_v40 = vld [vmem:[#allocation10 + $0xb0] ss:$12 sps:$4 sm:$0xff]  }
 0x4d6   :  { %3178 = vmatprep.subr.bf16.mxu1 %v3741_v0 }
 0x4d9   :  { %3179 = vmatpush3.bf16.msra.mxu1 %v3335_v41  ;;  %v3418_v41 = vld [vmem:[#allocation10 + $0x184] ss:$12 sps:$4 sm:$0xff]  }
 0x4da   :  { %3180 = vmatprep.subr.bf16.mxu1 %v3741_v0 }
 0x4dd   :  { %3181 = vmatpush3.bf16.msra.mxu1 %v3339_v42  ;;  %v815_v42 = vlaneseq }
 0x4de   :  { %3182 = vmatprep.subr.bf16.mxu1 %v3741_v0 }
 0x4e1   :  { %3183 = vmatpush3.bf16.msra.mxu1 %v3343_v43  ;;  %v816_v43 = vshrl.u32 %v815_v42, 7  ;;  %v3466_v42 = vld [vmem:[#allocation10 + $0x2d0] ss:$12 sps:$4 sm:$0xff]  }
 0x4e2   :  { %3184 = vmatprep.subr.bf16.mxu1 %v3741_v0 }
 0x4e3   :  { %v4024_v46 = vsub.s32 1, %v816_v43 }
 0x4e5   :  { %3185 = vmatpush3.bf16.msra.mxu1 %v3347_v44  ;;  %v4017_v44 = vsub.s32 0, %v816_v43  ;;  %v822_v49 = vrot.slane %v4022_v45, %v4024_v46 }
 0x4e6   :  { %3186 = vmatprep.subr.bf16.mxu1 %v3741_v0 }
 0x4e9   :  { %3187 = vmatpush3.bf16.msra.mxu1 %v3351_v47  ;;  %v818_v47 = vrot.slane %v4022_v45, %v4017_v44 }
 0x4ea   :  { %2971 = vmatprep.subr.bf16.mxu1 %v3379_v50 }
 0x59f   :  { %v774_v52 = vpop.f32.mrb[8].mxu1 }
 0x5a0   :  { %v775_v53 = vadd.f32 %v2711_v51, %v774_v52  ;;  %v3170_v54 = vpop.f32.mrb[9].mxu1 }
 0x5a1   :  { %v777_v55 = vpop.f32.mrb[10].mxu1 }
 0x5a2   :  { %v813_v58 = vpack.c.bf16 %v775_v53, %v775_v53  ;;  %v3171_v59 = vpop.f32.mrb[11].mxu1 }
 0x5a4   :  { %991 = vmatmul.mubr.bf16.vlgmr.msra.gmra.mrb[12].mxu0 %v813_v58  ;;  %3189 = vmatmul.mubr.bf16.vlgmr.msra.gmra.mrb[12].mxu1 %v813_v58 }
 0x5a5   :  { %1543 = vmatpush1.bf16.msra.mxu0 %v3352_v56  ;;  %2972 = vmatpush3.bf16.msra.mxu1 %v3380_v57 }
 0x5a6   :  { %1544 = vmatprep.subr.bf16.mxu0 %v3357_v60  ;;  %2973 = vmatprep.subr.bf16.mxu1 %v3384_v61 }
 0x5a9   :  { %1545 = vmatpush1.bf16.msra.mxu0 %v3355_v62  ;;  %2974 = vmatpush3.bf16.msra.mxu1 %v3385_v63  ;;  %v3416_v63 = vld [vmem:[#allocation10 + $0x180] ss:$12 sps:$4 sm:$0xff]  }
 0x5aa   :  { %1546 = vmatprep.subr.bf16.mxu0 %v3360_v1  ;;  %2975 = vmatprep.subr.bf16.mxu1 %v3389_v2  ;;  %v3419_v1 = vld [vmem:[#allocation10 + $0x188] ss:$12 sps:$4 sm:$0xff]  }
 0x5ad   :  { %1547 = vmatpush1.bf16.msra.mxu0 %v3358_v3  ;;  %2976 = vmatpush3.bf16.msra.mxu1 %v3390_v4  ;;  %v3422_v3 = vld [vmem:[#allocation10 + $0x19c] ss:$12 sps:$4 sm:$0xff]   ;;  %v3420_v4 = vld [vmem:[#allocation10 + $0x198] ss:$12 sps:$4 sm:$0xff]  }
 0x5ae   :  { %1548 = vmatprep.subr.bf16.mxu0 %v3363_v5  ;;  %2977 = vmatprep.subr.bf16.mxu1 %v3394_v6  ;;  %v3423_v5 = vld [vmem:[#allocation10 + $0x1a0] ss:$12 sps:$4 sm:$0xff]  }
 0x5af   :  { %v3426_v6 = vld [vmem:[#allocation10 + $0x1b4] ss:$12 sps:$4 sm:$0xff]  }
 0x5b1   :  { %1549 = vmatpush1.bf16.msra.mxu0 %v3361_v7  ;;  %2978 = vmatpush3.bf16.msra.mxu1 %v3395_v8  ;;  %v3424_v7 = vld [vmem:[#allocation10 + $0x1b0] ss:$12 sps:$4 sm:$0xff]   ;;  %v3427_v8 = vld [vmem:[#allocation10 + $0x1b8] ss:$12 sps:$4 sm:$0xff]  }
 0x5b2   :  { %1550 = vmatprep.subr.bf16.mxu0 %v3366_v9  ;;  %2979 = vmatprep.subr.bf16.mxu1 %v3399_v10  ;;  %v3430_v9 = vld [vmem:[#allocation10 + $0x1cc] ss:$12 sps:$4 sm:$0xff]   ;;  %v3428_v10 = vld [vmem:[#allocation10 + $0x1c8] ss:$12 sps:$4 sm:$0xff]  }
 0x5b5   :  { %1551 = vmatpush1.bf16.msra.mxu0 %v3364_v11  ;;  %2980 = vmatpush3.bf16.msra.mxu1 %v3400_v12  ;;  %v3431_v11 = vld [vmem:[#allocation10 + $0x1d0] ss:$12 sps:$4 sm:$0xff]  }
 0x5b6   :  { %1552 = vmatprep.subr.bf16.mxu0 %v3369_v13  ;;  %2981 = vmatprep.subr.bf16.mxu1 %v3404_v14  ;;  %v3434_v12 = vld [vmem:[#allocation10 + $0x1e4] ss:$12 sps:$4 sm:$0xff]   ;;  %v3432_v13 = vld [vmem:[#allocation10 + $0x1e0] ss:$12 sps:$4 sm:$0xff]   ;;  %v3435_v14 = vld [vmem:[#allocation10 + $0x1e8] ss:$12 sps:$4 sm:$0xff]  }
 0x5b9   :  { %1553 = vmatpush1.bf16.msra.mxu0 %v3367_v15  ;;  %2982 = vmatpush3.bf16.msra.mxu1 %v3405_v16  ;;  %v4046_v15 = vsub.s32 2, %v816_v43  ;;  %v3438_v16 = vld [vmem:[#allocation10 + $0x1fc] ss:$12 sps:$4 sm:$0xff]   ;;  %v3471_v43 = vld [vmem:[#allocation10 + $0x2ec] ss:$12 sps:$4 sm:$0xff]  }
 0x5ba   :  { %1554 = vmatprep.subr.bf16.mxu0 %v3372_v17  ;;  %2983 = vmatprep.subr.bf16.mxu1 %v3409_v34  ;;  %v3436_v17 = vld [vmem:[#allocation10 + $0x1f8] ss:$12 sps:$4 sm:$0xff]   ;;  %v3454_v34 = vld [vmem:[#allocation10 + $0x270] ss:$12 sps:$4 sm:$0xff]  }
 0x5bd   :  { %1555 = vmatpush1.bf16.msra.mxu0 %v3370_v18  ;;  %2984 = vmatpush3.bf16.msra.mxu1 %v3410_v36  ;;  %v3439_v18 = vld [vmem:[#allocation10 + $0x200] ss:$12 sps:$4 sm:$0xff]   ;;  %v3457_v36 = vld [vmem:[#allocation10 + $0x288] ss:$12 sps:$4 sm:$0xff]  }
 0x5be   :  { %1556 = vmatprep.subr.bf16.mxu0 %v3375_v19  ;;  %2985 = vmatprep.subr.bf16.mxu1 %v3414_v38  ;;  %v826_v19 = vrot.slane %v4022_v45, %v4046_v15  ;;  %v3460_v38 = vld [vmem:[#allocation10 + $0x2a0] ss:$12 sps:$4 sm:$0xff]   ;;  %v3469_v45 = vld [vmem:[#allocation10 + $0x2e8] ss:$12 sps:$4 sm:$0xff]  }
 0x5c1   :  { %1557 = vmatpush1.bf16.msra.mxu0 %v3373_v20  ;;  %2986 = vmatpush3.bf16.msra.mxu1 %v3415_v40  ;;  %v3442_v20 = vld [vmem:[#allocation10 + $0x214] ss:$12 sps:$4 sm:$0xff]   ;;  %v3463_v40 = vld [vmem:[#allocation10 + $0x2b8] ss:$12 sps:$4 sm:$0xff]  }
 0x5c2   :  { %1558 = vmatprep.subr.bf16.mxu0 %v3378_v21  ;;  %3192 = vmatprep.subr.bf16.mxu1 %v3741_v0  ;;  %v3440_v21 = vld [vmem:[#allocation10 + $0x210] ss:$12 sps:$4 sm:$0xff]  }
 0x5c5   :  { %1559 = vmatpush1.bf16.msra.mxu0 %v3376_v22  ;;  %v3443_v22 = vld [vmem:[#allocation10 + $0x218] ss:$12 sps:$4 sm:$0xff]  }
 0x5c6   :  { %1560 = vmatprep.subr.bf16.mxu0 %v3383_v23 }
 0x5c9   :  { %1561 = vmatpush1.bf16.msra.mxu0 %v3381_v24  ;;  %v3446_v24 = vld [vmem:[#allocation10 + $0x22c] ss:$12 sps:$4 sm:$0xff]  }
 0x5ca   :  { %1562 = vmatprep.subr.bf16.mxu0 %v3388_v25  ;;  %v3444_v25 = vld [vmem:[#allocation10 + $0x228] ss:$12 sps:$4 sm:$0xff]  }
 0x5cd   :  { %1563 = vmatpush1.bf16.msra.mxu0 %v3386_v26  ;;  %v3447_v26 = vld [vmem:[#allocation10 + $0x230] ss:$12 sps:$4 sm:$0xff]  }
 0x5ce   :  { %1564 = vmatprep.subr.bf16.mxu0 %v3393_v27 }
 0x5d1   :  { %1565 = vmatpush1.bf16.msra.mxu0 %v3391_v28  ;;  %v3450_v28 = vld [vmem:[#allocation10 + $0x244] ss:$12 sps:$4 sm:$0xff]  }
 0x5d2   :  { %1566 = vmatprep.subr.bf16.mxu0 %v3398_v29  ;;  %v3448_v29 = vld [vmem:[#allocation10 + $0x240] ss:$12 sps:$4 sm:$0xff]  }
 0x5d5   :  { %1567 = vmatpush1.bf16.msra.mxu0 %v3396_v30 }
 0x5d6   :  { %1568 = vmatprep.subr.bf16.mxu0 %v3403_v31  ;;  %v3453_v31 = vld [vmem:[#allocation10 + $0x25c] ss:$12 sps:$4 sm:$0xff]  }
 0x5d9   :  { %1569 = vmatpush1.bf16.msra.mxu0 %v3401_v32  ;;  %v3451_v32 = vld [vmem:[#allocation10 + $0x258] ss:$12 sps:$4 sm:$0xff]  }
 0x5da   :  { %1570 = vmatprep.subr.bf16.mxu0 %v3408_v33  ;;  %v3456_v33 = vld [vmem:[#allocation10 + $0x274] ss:$12 sps:$4 sm:$0xff]  }
 0x5dd   :  { %1571 = vmatpush1.bf16.msra.mxu0 %v3406_v35  ;;  %v3459_v35 = vld [vmem:[#allocation10 + $0x28c] ss:$12 sps:$4 sm:$0xff]  }
 0x5de   :  { %1572 = vmatprep.subr.bf16.mxu0 %v3413_v37  ;;  %v3462_v37 = vld [vmem:[#allocation10 + $0x2a4] ss:$12 sps:$4 sm:$0xff]  }
 0x5e1   :  { %1573 = vmatpush1.bf16.msra.mxu0 %v3411_v39  ;;  %v3465_v39 = vld [vmem:[#allocation10 + $0x2bc] ss:$12 sps:$4 sm:$0xff]  }
 0x5e2   :  { %1583 = vmatprep.subr.bf16.mxu0 %v3418_v41  ;;  %v3468_v41 = vld [vmem:[#allocation10 + $0x2d4] ss:$12 sps:$4 sm:$0xff]  }
 0x677   :  { %v992_v50 = vpop.f32.mrb[12].mxu0  ;;  %v4030_v51 = vpop.f32.mrb[12].mxu1 }
 0x678   :  { %v993_v52 = vadd.f32 %v992_v50, %v818_v47  ;;  %v994_v53 = vpop.f32.mrb[13].mxu0  ;;  %v3190_v54 = vpop.f32.mrb[13].mxu1  ;;  %v1034_v23 = vadd.f32 %v4030_v51, %v826_v19  ;;  %v3474_v47 = vld [vmem:[#allocation10 + $0x304] ss:$12 sps:$4 sm:$0xff]   ;;  %v3476_v50 = vld [vmem:[#allocation10 + $0x248] ss:$12 sps:$4 sm:$0xff]  }
 0x679   :  { %v995_v55 = vadd.f32 %v994_v53, %v822_v49  ;;  %v996_v56 = vpop.f32.mrb[14].mxu0  ;;  %v1036_v57 = vpop.f32.mrb[14].mxu1  ;;  %v3475_v49 = vld [vmem:[#allocation10 + $0x308] ss:$12 sps:$4 sm:$0xff]   ;;  %v3472_v51 = vld [vmem:[#allocation10 + $0x300] ss:$12 sps:$4 sm:$0xff]  }
 0x67a   :  { %v4032_v58 = vmax.f32 %v993_v52, 0.0  ;;  %v997_v59 = vpop.f32.mrb[15].mxu0  ;;  %v3191_v60 = vpop.f32.mrb[15].mxu1  ;;  %v4054_v27 = vmax.f32 %v1034_v23, 0.0  ;;  %v3480_v52 = vld [vmem:[#allocation10 + $0x320] ss:$12 sps:$4 sm:$0xff]  }
 0x67b   :  { %v4034_v61 = vmax.f32 %v995_v55, 0.0  ;;  %v3479_v53 = vld [vmem:[#allocation10 + $0x31c] ss:$12 sps:$4 sm:$0xff]   ;;  %v3481_v54 = vld [vmem:[#allocation10 + $0x260] ss:$12 sps:$4 sm:$0xff]  }
 0x67c   :  { %v1139_v2 = vpack.c.bf16 %v4032_v58, %v4032_v58  ;;  %v1141_v30 = vpack.c.bf16 %v4054_v27, %v4054_v27  ;;  %v3485_v55 = vld [vmem:[#allocation10 + $0x338] ss:$12 sps:$4 sm:$0xff]   ;;  %v3484_v57 = vld [vmem:[#allocation10 + $0x334] ss:$12 sps:$4 sm:$0xff]   ;;  %v3490_v60 = vld [vmem:[#allocation10 + $0x350] ss:$12 sps:$4 sm:$0xff]  }
 0x67d   :  { %v1140_v62 = vpack.c.bf16 %v4034_v61, %v4034_v61  ;;  %v3477_v56 = vld [vmem:[#allocation10 + $0x318] ss:$12 sps:$4 sm:$0xff]   ;;  %v3511_v19 = vld [vmem:[#allocation10 + $0x2f0] ss:$12 sps:$4 sm:$0xff]  }
 0x67e   :  { %v3486_v59 = vld [vmem:[#allocation10 + $0x278] ss:$12 sps:$4 sm:$0xff]  }
 0x67f   :  { %1574 = vmatprep.mubr.bf16.mxu0 %v1140_v62  ;;  %1656 = vmatprep.mubr.bf16.mxu1 %v1140_v62  ;;  %v3482_v62 = vld [vmem:[#allocation10 + $0x330] ss:$12 sps:$4 sm:$0xff]  }
 0x680   :  { %1575 = vmatmul.mubr.bf16.vlgmr.msra.gmra.mrb[16].mxu0 %v1139_v2  ;;  %1657 = vmatmul.mubr.bf16.vlgmr.msra.gmra.mrb[16].mxu1 %v1139_v2  ;;  %v3495_v2 = vld [vmem:[#allocation10 + $0x368] ss:$12 sps:$4 sm:$0xff]  }
 0x681   :  { %1584 = vmatpush1.bf16.msra.mxu0 %v3416_v63  ;;  %3193 = vmatpush3.bf16.msra.mxu1 %v3419_v1  ;;  %v3489_v63 = vld [vmem:[#allocation10 + $0x34c] ss:$12 sps:$4 sm:$0xff]   ;;  %v3491_v1 = vld [vmem:[#allocation10 + $0x290] ss:$12 sps:$4 sm:$0xff]  }
 0x682   :  { %1585 = vmatprep.subr.bf16.mxu0 %v3422_v3  ;;  %3194 = vmatprep.subr.bf16.mxu1 %v3741_v0  ;;  %v3487_v3 = vld [vmem:[#allocation10 + $0x348] ss:$12 sps:$4 sm:$0xff]  }
 0x683   :  { %1615 = vmatprep.mubr.bf16.mxu0 %v3743_v48  ;;  %3208 = vmatprep.mubr.msk.bf16.mxu1 %vm3742_vm0, %v3741_v0 }
 0x685   :  { %1586 = vmatpush1.bf16.msra.mxu0 %v3420_v4  ;;  %3195 = vmatpush3.bf16.msra.mxu1 %v3423_v5  ;;  %v3494_v4 = vld [vmem:[#allocation10 + $0x364] ss:$12 sps:$4 sm:$0xff]   ;;  %v3496_v5 = vld [vmem:[#allocation10 + $0x2a8] ss:$12 sps:$4 sm:$0xff]  }
 0x686   :  { %1587 = vmatprep.subr.bf16.mxu0 %v3426_v6  ;;  %3196 = vmatprep.subr.bf16.mxu1 %v3741_v0  ;;  %v3500_v6 = vld [vmem:[#allocation10 + $0x380] ss:$12 sps:$4 sm:$0xff]  }
 0x689   :  { %1588 = vmatpush1.bf16.msra.mxu0 %v3424_v7  ;;  %3197 = vmatpush3.bf16.msra.mxu1 %v3427_v8  ;;  %v3492_v7 = vld [vmem:[#allocation10 + $0x360] ss:$12 sps:$4 sm:$0xff]   ;;  %v3499_v8 = vld [vmem:[#allocation10 + $0x37c] ss:$12 sps:$4 sm:$0xff]  }
 0x68a   :  { %1589 = vmatprep.subr.bf16.mxu0 %v3430_v9  ;;  %3198 = vmatprep.subr.bf16.mxu1 %v3741_v0  ;;  %v3501_v9 = vld [vmem:[#allocation10 + $0x2c0] ss:$12 sps:$4 sm:$0xff]  }
 0x68d   :  { %1590 = vmatpush1.bf16.msra.mxu0 %v3428_v10  ;;  %3199 = vmatpush3.bf16.msra.mxu1 %v3431_v11  ;;  %v3497_v10 = vld [vmem:[#allocation10 + $0x378] ss:$12 sps:$4 sm:$0xff]   ;;  %v3504_v11 = vld [vmem:[#allocation10 + $0x394] ss:$12 sps:$4 sm:$0xff]  }
 0x68e   :  { %1591 = vmatprep.subr.bf16.mxu0 %v3434_v12  ;;  %3200 = vmatprep.subr.bf16.mxu1 %v3741_v0  ;;  %v3505_v12 = vld [vmem:[#allocation10 + $0x398] ss:$12 sps:$4 sm:$0xff]  }
 0x691   :  { %1592 = vmatpush1.bf16.msra.mxu0 %v3432_v13  ;;  %3201 = vmatpush3.bf16.msra.mxu1 %v3435_v14  ;;  %v3502_v13 = vld [vmem:[#allocation10 + $0x390] ss:$12 sps:$4 sm:$0xff]   ;;  %v3506_v14 = vld [vmem:[#allocation10 + $0x2d8] ss:$12 sps:$4 sm:$0xff]  }
 0x692   :  { %1593 = vmatprep.subr.bf16.mxu0 %v3438_v16  ;;  %3202 = vmatprep.subr.bf16.mxu1 %v3741_v0  ;;  %v3509_v16 = vld [vmem:[#allocation10 + $0x3ac] ss:$12 sps:$4 sm:$0xff]  }
 0x695   :  { %1594 = vmatpush1.bf16.msra.mxu0 %v3436_v17  ;;  %3203 = vmatpush3.bf16.msra.mxu1 %v3439_v18  ;;  %v3510_v17 = vld [vmem:[#allocation10 + $0x3b0] ss:$12 sps:$4 sm:$0xff]   ;;  %v3507_v18 = vld [vmem:[#allocation10 + $0x3a8] ss:$12 sps:$4 sm:$0xff]  }
 0x696   :  { %1595 = vmatprep.subr.bf16.mxu0 %v3442_v20  ;;  %3204 = vmatprep.subr.bf16.mxu1 %v3741_v0  ;;  %v3514_v20 = vld [vmem:[#allocation10 + $0x3c4] ss:$12 sps:$4 sm:$0xff]  }
 0x699   :  { %1596 = vmatpush1.bf16.msra.mxu0 %v3440_v21  ;;  %3205 = vmatpush3.bf16.msra.mxu1 %v3443_v22 }
 0x69a   :  { %1597 = vmatprep.subr.bf16.mxu0 %v3446_v24  ;;  %3206 = vmatprep.subr.bf16.mxu1 %v3741_v0 }
 0x69d   :  { %1598 = vmatpush1.bf16.msra.mxu0 %v3444_v25  ;;  %3207 = vmatpush3.bf16.msra.mxu1 %v3447_v26  ;;  %v1138_v26 = vld [vmem:[%s4114_s10] sm:$0x7] }
 0x69e   :  { %2209 = vmatprep.subr.bf16.mxu1 %v3450_v28  ;;  %3002 = vmatprep.subr.bf16.mxu0 %v3475_v49  ;;  %v1154_v28 = vrot.slane %v1138_v26, %v4046_v15  ;;  %v3512_v49 = vld [vmem:[#allocation10 + $0x3c0] ss:$12 sps:$4 sm:$0xff]  }
 0x6a0   :  { %1616 = vmatmul.mubr.bf16.vlgmr.msra.gmra.mrb[16].mxu0 %v1141_v30  ;;  %3209 = vmatmul.mubr.bf16.vlgmr.msra.gmra.mrb[20].mxu1 %v1141_v30  ;;  %v1150_v30 = vrot.slane %v1138_v26, %v4024_v46 }
 0x6a1   :  { %2210 = vmatpush1.bf16.msra.mxu1 %v3448_v29  ;;  %3003 = vmatpush3.bf16.msra.mxu0 %v3476_v50  ;;  %v1146_v29 = vrot.slane %v1138_v26, %v4017_v44  ;;  %v3515_v50 = vld [vmem:[#allocation10 + $0x3c8] ss:$12 sps:$4 sm:$0xff]   ;;  %v3557_v26 = vld [vmem:[#allocation12 + $0x60] sm:$0xff]  }
 0x6a2   :  { %2211 = vmatprep.subr.bf16.mxu1 %v3453_v31  ;;  %3004 = vmatprep.subr.bf16.mxu0 %v3480_v52  ;;  %v3518_v52 = vld [vmem:[#allocation10 + $0x3dc] ss:$12 sps:$4 sm:$0xff]  }
 0x6a5   :  { %2212 = vmatpush1.bf16.msra.mxu1 %v3451_v32  ;;  %3005 = vmatpush3.bf16.msra.mxu0 %v3481_v54  ;;  %v3519_v54 = vld [vmem:[#allocation10 + $0x3e0] ss:$12 sps:$4 sm:$0xff]  }
 0x6a6   :  { %2213 = vmatprep.subr.bf16.mxu1 %v3456_v33  ;;  %3006 = vmatprep.subr.bf16.mxu0 %v3485_v55  ;;  %v3522_v55 = vld [vmem:[#allocation10 + $0x3f4] ss:$12 sps:$4 sm:$0xff]  }
 0x6a9   :  { %2214 = vmatpush1.bf16.msra.mxu1 %v3454_v34  ;;  %3007 = vmatpush3.bf16.msra.mxu0 %v3486_v59  ;;  %v3526_v59 = vld [vmem:[#allocation10 + $0x40c] ss:$12 sps:$4 sm:$0xff]  }
 0x6aa   :  { %2215 = vmatprep.subr.bf16.mxu1 %v3459_v35  ;;  %3008 = vmatprep.subr.bf16.mxu0 %v3490_v60  ;;  %v3524_v60 = vld [vmem:[#allocation10 + $0x408] ss:$12 sps:$4 sm:$0xff]  }
 0x6ad   :  { %2216 = vmatpush1.bf16.msra.mxu1 %v3457_v36  ;;  %3009 = vmatpush3.bf16.msra.mxu0 %v3491_v1  ;;  %v3531_v1 = vld [vmem:[#allocation10 + $0x428] ss:$12 sps:$4 sm:$0xff]  }
 0x6ae   :  { %2217 = vmatprep.subr.bf16.mxu1 %v3462_v37  ;;  %3010 = vmatprep.subr.bf16.mxu0 %v3495_v2  ;;  %v3534_v2 = vld [vmem:[#allocation10 + $0x43c] ss:$12 sps:$4 sm:$0xff]  }
 0x6b1   :  { %2218 = vmatpush1.bf16.msra.mxu1 %v3460_v38  ;;  %3011 = vmatpush3.bf16.msra.mxu0 %v3496_v5  ;;  %v3538_v5 = vld [vmem:[#allocation10 + $0x454] ss:$12 sps:$4 sm:$0xff]  }
 0x6b2   :  { %2219 = vmatprep.subr.bf16.mxu1 %v3465_v39  ;;  %3012 = vmatprep.subr.bf16.mxu0 %v3500_v6  ;;  %v3536_v6 = vld [vmem:[#allocation10 + $0x450] ss:$12 sps:$4 sm:$0xff]  }
 0x6b5   :  { %2220 = vmatpush1.bf16.msra.mxu1 %v3463_v40  ;;  %3013 = vmatpush3.bf16.msra.mxu0 %v3501_v9  ;;  %v3540_v9 = vld [vmem:[#allocation10 + $0x468] ss:$12 sps:$4 sm:$0xff]  }
 0x6b6   :  { %2221 = vmatprep.subr.bf16.mxu1 %v3468_v41  ;;  %3014 = vmatprep.subr.bf16.mxu0 %v3505_v12 }
 0x6b9   :  { %2222 = vmatpush1.bf16.msra.mxu1 %v3466_v42  ;;  %3015 = vmatpush3.bf16.msra.mxu0 %v3506_v14  ;;  %v3545_v14 = vld [vmem:[#allocation12 + $0x40] sm:$0xff]  }
 0x6ba   :  { %2223 = vmatprep.subr.bf16.mxu1 %v3471_v43  ;;  %3016 = vmatprep.subr.bf16.mxu0 %v3510_v17  ;;  %v3548_v17 = vld [vmem:[#allocation12 + $0x48] sm:$0xff]  }
 0x6bd   :  { %2224 = vmatpush1.bf16.msra.mxu1 %v3469_v45  ;;  %3017 = vmatpush3.bf16.msra.mxu0 %v3511_v19  ;;  %v3549_v19 = vld [vmem:[#allocation12 + $0x8] sm:$0xff]  }
 0x6be   :  { %2225 = vmatprep.subr.bf16.mxu1 %v3474_v47  ;;  %3212 = vmatprep.subr.bf16.mxu0 %v3741_v0 }
 0x6c1   :  { %2226 = vmatpush1.bf16.msra.mxu1 %v3472_v51 }
 0x6c2   :  { %2227 = vmatprep.subr.bf16.mxu1 %v3479_v53  ;;  %v3516_v53 = vld [vmem:[#allocation10 + $0x3d8] ss:$12 sps:$4 sm:$0xff]  }
 0x6c5   :  { %2228 = vmatpush1.bf16.msra.mxu1 %v3477_v56  ;;  %v3520_v56 = vld [vmem:[#allocation10 + $0x3f0] ss:$12 sps:$4 sm:$0xff]  }
 0x6c6   :  { %2229 = vmatprep.subr.bf16.mxu1 %v3484_v57  ;;  %v3523_v57 = vld [vmem:[#allocation10 + $0x3f8] ss:$12 sps:$4 sm:$0xff]  }
 0x6c9   :  { %2230 = vmatpush1.bf16.msra.mxu1 %v3482_v62  ;;  %v3527_v62 = vld [vmem:[#allocation10 + $0x410] ss:$12 sps:$4 sm:$0xff]  }
 0x6ca   :  { %2231 = vmatprep.subr.bf16.mxu1 %v3489_v63  ;;  %v3530_v63 = vld [vmem:[#allocation10 + $0x424] ss:$12 sps:$4 sm:$0xff]  }
 0x6cd   :  { %2232 = vmatpush1.bf16.msra.mxu1 %v3487_v3  ;;  %v3532_v3 = vld [vmem:[#allocation10 + $0x438] ss:$12 sps:$4 sm:$0xff]  }
 0x6ce   :  { %2233 = vmatprep.subr.bf16.mxu1 %v3494_v4  ;;  %v3535_v4 = vld [vmem:[#allocation10 + $0x440] ss:$12 sps:$4 sm:$0xff]  }
 0x6d1   :  { %2234 = vmatpush1.bf16.msra.mxu1 %v3492_v7  ;;  %v3539_v7 = vld [vmem:[#allocation10 + $0x458] ss:$12 sps:$4 sm:$0xff]  }
 0x6d2   :  { %2235 = vmatprep.subr.bf16.mxu1 %v3499_v8  ;;  %v3542_v8 = vld [vmem:[#allocation10 + $0x46c] ss:$12 sps:$4 sm:$0xff]  }
 0x6d5   :  { %2236 = vmatpush1.bf16.msra.mxu1 %v3497_v10  ;;  %v3543_v10 = vld [vmem:[#allocation10 + $0x470] ss:$12 sps:$4 sm:$0xff]  }
 0x6d6   :  { %2237 = vmatprep.subr.bf16.mxu1 %v3504_v11 }
 0x6d9   :  { %2238 = vmatpush1.bf16.msra.mxu1 %v3502_v13  ;;  %v3544_v13 = vld [vmem:[#allocation12 + $0x80] sm:$0xff]  }
 0x6da   :  { %2239 = vmatprep.subr.bf16.mxu1 %v3509_v16  ;;  %v3546_v16 = vld [vmem:[#allocation12] sm:$0xff]  }
 0x6dd   :  { %2240 = vmatpush1.bf16.msra.mxu1 %v3507_v18  ;;  %v3547_v18 = vld [vmem:[#allocation12 + $0x88] sm:$0xff]  }
 0x6de   :  { %2250 = vmatprep.subr.bf16.mxu1 %v3514_v20  ;;  %v3551_v20 = vld [vmem:[#allocation12 + $0x50] sm:$0xff]  }
 0x753   :  { %v2987_v21 = vpop.f32.mrb[16].mxu1 }
 0x754   :  { %v2988_v22 = vpop.f32.mrb[17].mxu1 }
 0x755   :  { %v2989_v23 = vadd.f32 %v2988_v22, %v2987_v21  ;;  %v2990_v24 = vpop.f32.mrb[18].mxu1  ;;  %v3550_v21 = vld [vmem:[#allocation12 + $0x90] sm:$0xff]  }
 0x756   :  { %v2991_v25 = vpop.f32.mrb[19].mxu1  ;;  %v3552_v22 = vld [vmem:[#allocation12 + $0x10] sm:$0xff]   ;;  %v3553_v24 = vld [vmem:[#allocation12 + $0x98] sm:$0xff]  }
 0x757   :  { %v1659_v31 = vadd.f32 %v2989_v23, %v1154_v28  ;;  %v3554_v23 = vld [vmem:[#allocation12 + $0x58] sm:$0xff]   ;;  %v3556_v28 = vld [vmem:[#allocation12 + $0xa0] sm:$0xff]  }
 0x758   :  { %v3555_v25 = vld [vmem:[#allocation12 + $0x18] sm:$0xff]  }
 0x773   :  { %v1617_v32 = vpop.f32.mrb[16].mxu0  ;;  %v1698_v33 = vpop.f32.mrb[20].mxu1 }
 0x774   :  { %v3252_v34 = vadd.f32 %v1617_v32, %v1146_v29  ;;  %v4066_v35 = vadd.f32 %v1698_v33, %v1659_v31  ;;  %v1619_v36 = vpop.f32.mrb[17].mxu0  ;;  %v3210_v37 = vpop.f32.mrb[21].mxu1  ;;  %v3558_v29 = vld [vmem:[#allocation12 + $0x20] sm:$0xff]   ;;  %v3559_v31 = vld [vmem:[#allocation12 + $0xa8] sm:$0xff]   ;;  %v3562_v33 = vld [vmem:[#allocation12 + $0xb0] sm:$0xff]  }
 0x775   :  { %v3253_v38 = vadd.f32 %v1619_v36, %v1150_v30  ;;  %v1621_v39 = vpop.f32.mrb[18].mxu0  ;;  %v1701_v40 = vpop.f32.mrb[22].mxu1  ;;  %v3560_v30 = vld [vmem:[#allocation12 + $0x68] sm:$0xff]   ;;  %v3565_v36 = vld [vmem:[#allocation12 + $0xb8] sm:$0xff]  }
 0x776   :  { %v1704_v41 = vmax.f32 %v3252_v34, 0.0  ;;  %v1622_v42 = vpop.f32.mrb[19].mxu0  ;;  %v3211_v43 = vpop.f32.mrb[23].mxu1  ;;  %v1706_v11 = vmax.f32 %v4066_v35, 0.0  ;;  %v3561_v32 = vld [vmem:[#allocation12 + $0x28] sm:$0xff]   ;;  %v3563_v34 = vld [vmem:[#allocation12 + $0x70] sm:$0xff]  }
 0x777   :  { %v1705_v45 = vmax.f32 %v3253_v38, 0.0  ;;  %v3564_v35 = vld [vmem:[#allocation12 + $0x30] sm:$0xff]   ;;  %v3566_v37 = vld [vmem:[#allocation12 + $0x78] sm:$0xff]  }
 0x778   :  { %v1806_v51 = vpack.c.bf16 %v1704_v41, %v1704_v41  ;;  %v1808_v12 = vpack.c.bf16 %v1706_v11, %v1706_v11  ;;  %v3567_v38 = vld [vmem:[#allocation12 + $0x38] sm:$0xff]  }
 0x779   :  { %v1807_v47 = vpack.c.bf16 %v1705_v45, %v1705_v45  ;;  %v2816_v45 = vld [vmem:[%s4114_s10 + $0x3] sm:$0x7] }
 0x77b   :  { %2241 = vmatprep.mubr.bf16.mxu1 %v1807_v47  ;;  %2323 = vmatprep.mubr.bf16.mxu0 %v1807_v47  ;;  %v1821_v47 = vrot.slane %v2816_v45, %v4046_v15 }
 0x77c   :  { %2242 = vmatmul.mubr.bf16.vlgmr.msra.gmra.mrb[24].mxu1 %v1806_v51  ;;  %2324 = vmatmul.mubr.bf16.vlgmr.msra.gmra.mrb[20].mxu0 %v1806_v51 }
 0x77d   :  { %2251 = vmatpush1.bf16.msra.mxu1 %v3512_v49  ;;  %3213 = vmatpush3.bf16.msra.mxu0 %v3515_v50  ;;  %v1817_v49 = vrot.slane %v2816_v45, %v4024_v46 }
 0x77e   :  { %2252 = vmatprep.subr.bf16.mxu1 %v3518_v52  ;;  %3214 = vmatprep.subr.bf16.mxu0 %v3741_v0 }
 0x77f   :  { %2282 = vmatprep.mubr.bf16.mxu1 %v3743_v48  ;;  %3228 = vmatprep.mubr.msk.bf16.mxu0 %vm3742_vm0, %v3741_v0  ;;  %v3528_v48 = vld [vmem:[#allocation10 + $0x420] ss:$12 sps:$4 sm:$0xff]  }
 0x781   :  { %2253 = vmatpush1.bf16.msra.mxu1 %v3516_v53  ;;  %3215 = vmatpush3.bf16.msra.mxu0 %v3519_v54 }
 0x782   :  { %2254 = vmatprep.subr.bf16.mxu1 %v3522_v55  ;;  %3216 = vmatprep.subr.bf16.mxu0 %v3741_v0 }
 0x785   :  { %2255 = vmatpush1.bf16.msra.mxu1 %v3520_v56  ;;  %3217 = vmatpush3.bf16.msra.mxu0 %v3523_v57 }
 0x786   :  { %2256 = vmatprep.subr.bf16.mxu1 %v3526_v59  ;;  %3218 = vmatprep.subr.bf16.mxu0 %v3741_v0 }
 0x789   :  { %2257 = vmatpush1.bf16.msra.mxu1 %v3524_v60  ;;  %3219 = vmatpush3.bf16.msra.mxu0 %v3527_v62 }
 0x78a   :  { %2258 = vmatprep.subr.bf16.mxu1 %v3530_v63  ;;  %3220 = vmatprep.subr.bf16.mxu0 %v3741_v0 }
 0x78d   :  { %2259 = vmatpush1.bf16.msra.mxu1 %v3528_v48  ;;  %3221 = vmatpush3.bf16.msra.mxu0 %v3531_v1 }
 0x78e   :  { %2260 = vmatprep.subr.bf16.mxu1 %v3534_v2  ;;  %3222 = vmatprep.subr.bf16.mxu0 %v3741_v0 }
 0x791   :  { %2261 = vmatpush1.bf16.msra.mxu1 %v3532_v3  ;;  %3223 = vmatpush3.bf16.msra.mxu0 %v3535_v4 }
 0x792   :  { %2262 = vmatprep.subr.bf16.mxu1 %v3538_v5  ;;  %3224 = vmatprep.subr.bf16.mxu0 %v3741_v0 }
 0x795   :  { %2263 = vmatpush1.bf16.msra.mxu1 %v3536_v6  ;;  %3225 = vmatpush3.bf16.msra.mxu0 %v3539_v7 }
 0x796   :  { %2264 = vmatprep.subr.bf16.mxu1 %v3542_v8  ;;  %3226 = vmatprep.subr.bf16.mxu0 %v3741_v0 }
 0x799   :  { %2265 = vmatpush1.bf16.msra.mxu1 %v3540_v9  ;;  %3227 = vmatpush3.bf16.msra.mxu0 %v3543_v10  ;;  %v2889_v10 = vld [vmem:[%s4116_s12] ss:$0 sm:$0xff] }
 0x79a   :  { %3232 = vmatprep.subr.bf16.mxu1 %v3741_v0  ;;  %3033 = vmatprep.subr.bf16.mxu0 %v3545_v14 }
 0x79c   :  { %2283 = vmatmul.mubr.bf16.vlgmr.msra.gmra.mrb[24].mxu1 %v1808_v12  ;;  %3229 = vmatmul.mubr.bf16.vlgmr.msra.gmra.mrb[24].mxu0 %v1808_v12 }
 0x79d   :  { %3248 = vmatprep.mubr.msk.bf16.mxu1 %vm3742_vm0, %v3741_v0  ;;  %3233 = vmatpush3.bf16.msra.mxu1 %v3544_v13 }
 0x79e   :  { %3034 = vmatpush3.bf16.msra.mxu0 %v3546_v16  ;;  %3234 = vmatprep.subr.bf16.mxu1 %v3741_v0 }
 0x79f   :  { %3035 = vmatprep.subr.bf16.mxu0 %v3548_v17 }
 0x7a1   :  { %3235 = vmatpush3.bf16.msra.mxu1 %v3547_v18 }
 0x7a2   :  { %3036 = vmatpush3.bf16.msra.mxu0 %v3549_v19  ;;  %3236 = vmatprep.subr.bf16.mxu1 %v3741_v0 }
 0x7a3   :  { %3037 = vmatprep.subr.bf16.mxu0 %v3551_v20 }
 0x7a5   :  { %3237 = vmatpush3.bf16.msra.mxu1 %v3550_v21 }
 0x7a6   :  { %3038 = vmatpush3.bf16.msra.mxu0 %v3552_v22  ;;  %3238 = vmatprep.subr.bf16.mxu1 %v3741_v0 }
 0x7a7   :  { %3039 = vmatprep.subr.bf16.mxu0 %v3554_v23 }
 0x7a9   :  { %3239 = vmatpush3.bf16.msra.mxu1 %v3553_v24 }
 0x7aa   :  { %3040 = vmatpush3.bf16.msra.mxu0 %v3555_v25  ;;  %3240 = vmatprep.subr.bf16.mxu1 %v3741_v0 }
 0x7ab   :  { %3041 = vmatprep.subr.bf16.mxu0 %v3557_v26 }
 0x7ad   :  { %3241 = vmatpush3.bf16.msra.mxu1 %v3556_v28 }
 0x7ae   :  { %3042 = vmatpush3.bf16.msra.mxu0 %v3558_v29  ;;  %3242 = vmatprep.subr.bf16.mxu1 %v3741_v0 }
 0x7af   :  { %3043 = vmatprep.subr.bf16.mxu0 %v3560_v30 }
 0x7b1   :  { %3243 = vmatpush3.bf16.msra.mxu1 %v3559_v31 }
 0x7b2   :  { %3244 = vmatprep.subr.bf16.mxu1 %v3741_v0  ;;  %3044 = vmatpush3.bf16.msra.mxu0 %v3561_v32 }
 0x7b3   :  { %3045 = vmatprep.subr.bf16.mxu0 %v3563_v34 }
 0x7b5   :  { %3245 = vmatpush3.bf16.msra.mxu1 %v3562_v33 }
 0x7b6   :  { %3246 = vmatprep.subr.bf16.mxu1 %v3741_v0  ;;  %3046 = vmatpush3.bf16.msra.mxu0 %v3564_v35  ;;  %v1813_v0 = vrot.slane %v2816_v45, %v4017_v44 }
 0x7b7   :  { %3047 = vmatprep.subr.bf16.mxu0 %v3566_v37 }
 0x7b9   :  { %3247 = vmatpush3.bf16.msra.mxu1 %v3565_v36 }
 0x7ba   :  { %3048 = vmatpush3.bf16.msra.mxu0 %v3567_v38 }
 0x84f   :  { %v3018_v39 = vpop.f32.mrb[20].mxu0 }
 0x850   :  { %v3019_v40 = vpop.f32.mrb[21].mxu0 }
 0x851   :  { %v3020_v41 = vadd.f32 %v3019_v40, %v3018_v39  ;;  %v3021_v42 = vpop.f32.mrb[22].mxu0 }
 0x852   :  { %v3022_v43 = vpop.f32.mrb[23].mxu0 }
 0x853   :  { %v2326_v50 = vadd.f32 %v3020_v41, %v1821_v47 }
 0x86f   :  { %v2284_v51 = vpop.f32.mrb[24].mxu1  ;;  %v2365_v52 = vpop.f32.mrb[24].mxu0 }
 0x870   :  { %v3254_v53 = vadd.f32 %v2284_v51, %v1813_v0  ;;  %v2366_v54 = vadd.f32 %v2365_v52, %v2326_v50  ;;  %v2286_v55 = vpop.f32.mrb[25].mxu1  ;;  %v3230_v56 = vpop.f32.mrb[25].mxu0 }
 0x871   :  { %v3255_v57 = vadd.f32 %v2286_v55, %v1817_v49  ;;  %v2288_v59 = vpop.f32.mrb[26].mxu1  ;;  %v2368_v60 = vpop.f32.mrb[26].mxu0 }
 0x872   :  { %v2371_v62 = vmax.f32 %v3254_v53, 0.0  ;;  %v2373_v63 = vmax.f32 %v2366_v54, 0.0  ;;  %v2289_v48 = vpop.f32.mrb[27].mxu1  ;;  %v3231_v1 = vpop.f32.mrb[27].mxu0 }
 0x873   :  { %v2372_v2 = vmax.f32 %v3255_v57, 0.0 }
 0x874   :  { %v2374_v15 = vadd.f32 %v2371_v62, %v4032_v58  ;;  %v2376_v44 = vadd.f32 %v2373_v63, %v4054_v27 }
 0x875   :  { %v2375_v46 = vadd.f32 %v2372_v2, %v4034_v61 }
 0x876   :  { %v2428_v3 = vpack.c.bf16 %v2376_v44, %v2376_v44  ;;  %v2426_v5 = vpack.c.bf16 %v2374_v15, %v2374_v15 }
 0x877   :  { %v2427_v4 = vpack.c.bf16 %v2375_v46, %v2375_v46 }
 0x878   :  { %3249 = vmatmul.mubr.bf16.vlgmr.msra.gmra.mrb[28].mxu1 %v2428_v3 }
 0x879   :  { %2611 = vmatprep.mubr.bf16.mxu0 %v2427_v4 }
 0x87a   :  { %2612 = vmatmul.mubr.bf16.vlgmr.msra.gmra.mrb[28].mxu0 %v2426_v5 }
 0x94b   :  { %v2653_v6 = vpop.f32.mrb[28].mxu1 }
 0x94c   :  { %v3250_v7 = vpop.f32.mrb[29].mxu1 }
 0x94d   :  { %v3049_v8 = vpop.f32.mrb[28].mxu0  ;;  %v2656_v9 = vpop.f32.mrb[30].mxu1 }
 0x94e   :  { %v3050_v11 = vpop.f32.mrb[29].mxu0  ;;  %v3251_v58 = vpop.f32.mrb[31].mxu1 }
 0x94f   :  { %v3051_v12 = vadd.f32 %v3050_v11, %v3049_v8  ;;  %v3052_v27 = vpop.f32.mrb[30].mxu0 }
 0x950   :  { %v3053_v13 = vpop.f32.mrb[31].mxu0 }
 0x951   :  { %v2614_v61 = vadd.f32 %v3051_v12, %v2889_v10 }
 0x953   :  { %v2654_v14 = vadd.f32 %v2653_v6, %v2614_v61 }
 0x955   :  { %2659 = vst [vmem:[%s4117_s13] sm:$0xff] %v2654_v14 }
 0x956   :  { %2664 = vsyncpa [#allocation3], 1 }
 0x957   :  { %2665 = vsyncpa [#allocation5], 1 }
 0x958   :  { %2666 = vsyncpa [#allocation8], 1 }
 0x959   :  { %2667 = vsyncpa [#allocation11], 1 }

</bundles_post_ra>
